<compile_context>
chip_gen: v6e
topology: v6e:2x2x1
jax: 0.10.0
libtpu: 0.0.40
codegen_flags: <defaults>
</compile_context>

<pallas_src>
import functools

import jax
import jax.numpy as jnp
from jax.experimental import pallas as pl
from jax.experimental.pallas import tpu as pltpu

LANE = 128     # pad the 1-wide value head to a full lane width for a dense store
TILE_B = 256   # batch tile for the batch-parallel path (matches 256-wide MXU on v6e/v7x)


def critic_kernel(x_ref, w1_ref, b1_ref, w2_ref, b2_ref, w3_ref, b3_ref, o_ref):
    # Layer 1: Linear + ReLU  (MXU matmul, f32 accumulate)
    h1 = jnp.dot(x_ref[...], w1_ref[...],
                 preferred_element_type=jnp.float32,
                 precision=jax.lax.Precision.HIGHEST)
    h1 = jnp.maximum(h1 + b1_ref[...], 0.0)          # b1 is [1, hidden], broadcasts over rows

    # Layer 2: Linear + ReLU
    h2 = jnp.dot(h1, w2_ref[...],
                 preferred_element_type=jnp.float32,
                 precision=jax.lax.Precision.HIGHEST)
    h2 = jnp.maximum(h2 + b2_ref[...], 0.0)

    # Layer 3: value head. w3/b3 were zero-padded from out_dim=1 to 128 columns at init time,
    # so this matmul produces a full 128-lane result and the store below is unmasked/lane-dense.
    v = jnp.dot(h2, w3_ref[...],
                preferred_element_type=jnp.float32,
                precision=jax.lax.Precision.HIGHEST) + b3_ref[...]
    o_ref[...] = v.astype(o_ref.dtype)


@jax.jit
def critic_forward(state, params):
    """state: [B, in_dim]; params = (w1, b1, w2, b2, w3_p, b3_p) with w*: [in, out]
    (pre-transposed vs torch Linear), b*: [1, out], w3_p/b3_p pre-padded to LANE columns.
    Returns [B, 1] (the real value column of the lane-padded kernel output)."""
    w1, b1, w2, b2, w3_p, b3_p = params
    B, in_dim = state.shape
    hidden = w1.shape[1]

    if B % TILE_B == 0 and B > TILE_B:
        # Batch-parallel path: tile the batch over a ("parallel",) grid. Weights keep
        # index_map -> (0, 0) so they stay VMEM-resident across grid steps; on v7x this
        # also shards tiles across both TensorCores.
        out_padded = pl.pallas_call(
            critic_kernel,
            out_shape=jax.ShapeDtypeStruct((B, LANE), jnp.float32),
            grid=(B // TILE_B,),
            in_specs=[
                pl.BlockSpec((TILE_B, in_dim), lambda i: (i, 0)),
                pl.BlockSpec((in_dim, hidden), lambda i: (0, 0)),
                pl.BlockSpec((1, hidden), lambda i: (0, 0)),
                pl.BlockSpec((hidden, hidden), lambda i: (0, 0)),
                pl.BlockSpec((1, hidden), lambda i: (0, 0)),
                pl.BlockSpec((hidden, LANE), lambda i: (0, 0)),
                pl.BlockSpec((1, LANE), lambda i: (0, 0)),
            ],
            out_specs=pl.BlockSpec((TILE_B, LANE), lambda i: (i, 0)),
            compiler_params=pltpu.CompilerParams(
                dimension_semantics=("parallel",),
            ),
        )(state, w1, b1, w2, b2, w3_p, b3_p)
    else:
        # Grid-less path: whole problem (~0.2 MB) resident in VMEM, single kernel invocation,
        # no pipeline prologue/epilogue or input double-buffering.
        out_padded = pl.pallas_call(
            critic_kernel,
            out_shape=jax.ShapeDtypeStruct((B, LANE), jnp.float32),
        )(state, w1, b1, w2, b2, w3_p, b3_p)

    # Jit-fused slice: extract the real 1-wide value column.
    return out_padded[:, :1]


def xavier_normal(key, fan_in, fan_out):
    # matches torch.nn.init.xavier_normal_: std = sqrt(2 / (fan_in + fan_out))
    std = (2.0 / (fan_in + fan_out)) ** 0.5
    return std * jax.random.normal(key, (fan_in, fan_out), dtype=jnp.float32)


def init_critic_params(key, input_size, hidden_size=128, out_dim=1):
    """Deterministic "xavier_weights_init_": xavier-normal weights, bias = 0.1.
    The value-head padding to LANE columns is done HERE, once, not per forward call."""
    k_w1, k_w2, k_w3 = jax.random.split(key, 3)
    w1 = xavier_normal(k_w1, input_size, hidden_size)     # stored as [in, hidden]
    b1 = jnp.full((1, hidden_size), 0.1, dtype=jnp.float32)
    w2 = xavier_normal(k_w2, hidden_size, hidden_size)    # stored as [hidden, hidden]
    b2 = jnp.full((1, hidden_size), 0.1, dtype=jnp.float32)
    w3 = xavier_normal(k_w3, hidden_size, out_dim)        # stored as [hidden, 1]
    b3 = jnp.full((1, out_dim), 0.1, dtype=jnp.float32)

    pad = LANE - out_dim
    w3_p = jnp.pad(w3, ((0, 0), (0, pad)))
    b3_p = jnp.pad(b3, ((0, 0), (0, pad)))

    params = (w1, b1, w2, b2, w3_p, b3_p)
    raw_head = (w3, b3)  # unpadded, for the pure-JAX reference
    return params, raw_head


def reference_forward(state, params, raw_head):
    w1, b1, w2, b2, _, _ = params
    w3, b3 = raw_head
    hi = jax.lax.Precision.HIGHEST
    h1 = jnp.maximum(jnp.dot(state, w1, precision=hi) + b1, 0.0)
    h2 = jnp.maximum(jnp.dot(h1, w2, precision=hi) + b2, 0.0)
    return jnp.dot(h2, w3, precision=hi) + b3


if __name__ == "__main__":
    input_size = 32
    hidden_size = 128
    output_size = 1

    key = jax.random.PRNGKey(0)
    k_state, k_params = jax.random.split(key, 2)
    params, raw_head = init_critic_params(k_params, input_size, hidden_size, output_size)

    # Path 1: small batch -> grid-less single-block kernel.
    B_small = 128
    state_small = jax.random.normal(k_state, (B_small, input_size), dtype=jnp.float32)
    out_small = jax.block_until_ready(critic_forward(state_small, params))
    ref_small = reference_forward(state_small, params, raw_head)
    assert out_small.shape == (B_small, output_size)
    assert jnp.allclose(out_small, ref_small, atol=1e-4, rtol=1e-4), "small-batch mismatch"

    # Path 2: larger batch -> batch-parallel tiled kernel (256-row tiles, "parallel" grid).
    B_big = 512
    state_big = jax.random.normal(jax.random.PRNGKey(1), (B_big, input_size), dtype=jnp.float32)
    out_big = jax.block_until_ready(critic_forward(state_big, params))
    ref_big = reference_forward(state_big, params, raw_head)
    assert out_big.shape == (B_big, output_size)
    assert jnp.allclose(out_big, ref_big, atol=1e-4, rtol=1e-4), "tiled-batch mismatch"

    print("KERNEL_OK")
</pallas_src>

<mosaic_0001>
module attributes {stable_mosaic.version = 11 : i64} {
  func.func @critic_kernel(%arg0: memref<128x32xf32, #tpu.memory_space<vmem>>, %arg1: memref<32x128xf32, #tpu.memory_space<vmem>>, %arg2: memref<1x128xf32, #tpu.memory_space<vmem>>, %arg3: memref<128x128xf32, #tpu.memory_space<vmem>>, %arg4: memref<1x128xf32, #tpu.memory_space<vmem>>, %arg5: memref<128x128xf32, #tpu.memory_space<vmem>>, %arg6: memref<1x128xf32, #tpu.memory_space<vmem>>, %arg7: memref<128x128xf32, #tpu.memory_space<vmem>>) attributes {dimension_semantics = [], scalar_prefetch = 0 : i64, scratch_operands = 0 : i64, tpu.core_type = #tpu.core_type<tc>} {
    %c0 = arith.constant 0 : index
    %c0_0 = arith.constant 0 : index
    %0 = vector.load %arg0[%c0, %c0_0] : memref<128x32xf32, #tpu.memory_space<vmem>>, vector<128x32xf32>
    %c0_1 = arith.constant 0 : index
    %c0_2 = arith.constant 0 : index
    %1 = vector.load %arg1[%c0_1, %c0_2] : memref<32x128xf32, #tpu.memory_space<vmem>>, vector<32x128xf32>
    %cst = arith.constant dense<0.000000e+00> : vector<128x128xf32>
    %2 = tpu.matmul %0, %1, %cst {dimension_numbers = #tpu.dot_dimension_numbers<[1], [0], [0], [1], [0, 0, 1, 1], [], []>, precision = #tpu.contract_precision<fp32>} : vector<128x32xf32>, vector<32x128xf32>, vector<128x128xf32> -> vector<128x128xf32>
    %c0_3 = arith.constant 0 : index
    %c0_4 = arith.constant 0 : index
    %3 = vector.load %arg2[%c0_3, %c0_4] : memref<1x128xf32, #tpu.memory_space<vmem>>, vector<1x128xf32>
    %4 = vector.broadcast %3 : vector<1x128xf32> to vector<128x128xf32>
    %5 = arith.addf %2, %4 : vector<128x128xf32>
    %cst_5 = arith.constant 0.000000e+00 : f32
    %6 = vector.broadcast %cst_5 : f32 to vector<128x128xf32>
    %7 = arith.maximumf %5, %6 : vector<128x128xf32>
    %c0_6 = arith.constant 0 : index
    %c0_7 = arith.constant 0 : index
    %8 = vector.load %arg3[%c0_6, %c0_7] : memref<128x128xf32, #tpu.memory_space<vmem>>, vector<128x128xf32>
    %cst_8 = arith.constant dense<0.000000e+00> : vector<128x128xf32>
    %9 = tpu.matmul %7, %8, %cst_8 {dimension_numbers = #tpu.dot_dimension_numbers<[1], [0], [0], [1], [0, 0, 1, 1], [], []>, precision = #tpu.contract_precision<fp32>} : vector<128x128xf32>, vector<128x128xf32>, vector<128x128xf32> -> vector<128x128xf32>
    %c0_9 = arith.constant 0 : index
    %c0_10 = arith.constant 0 : index
    %10 = vector.load %arg4[%c0_9, %c0_10] : memref<1x128xf32, #tpu.memory_space<vmem>>, vector<1x128xf32>
    %11 = vector.broadcast %10 : vector<1x128xf32> to vector<128x128xf32>
    %12 = arith.addf %9, %11 : vector<128x128xf32>
    %cst_11 = arith.constant 0.000000e+00 : f32
    %13 = vector.broadcast %cst_11 : f32 to vector<128x128xf32>
    %14 = arith.maximumf %12, %13 : vector<128x128xf32>
    %c0_12 = arith.constant 0 : index
    %c0_13 = arith.constant 0 : index
    %15 = vector.load %arg5[%c0_12, %c0_13] : memref<128x128xf32, #tpu.memory_space<vmem>>, vector<128x128xf32>
    %cst_14 = arith.constant dense<0.000000e+00> : vector<128x128xf32>
    %16 = tpu.matmul %14, %15, %cst_14 {dimension_numbers = #tpu.dot_dimension_numbers<[1], [0], [0], [1], [0, 0, 1, 1], [], []>, precision = #tpu.contract_precision<fp32>} : vector<128x128xf32>, vector<128x128xf32>, vector<128x128xf32> -> vector<128x128xf32>
    %c0_15 = arith.constant 0 : index
    %c0_16 = arith.constant 0 : index
    %17 = vector.load %arg6[%c0_15, %c0_16] : memref<1x128xf32, #tpu.memory_space<vmem>>, vector<1x128xf32>
    %18 = vector.broadcast %17 : vector<1x128xf32> to vector<128x128xf32>
    %19 = arith.addf %16, %18 : vector<128x128xf32>
    %c0_17 = arith.constant 0 : index
    %c0_18 = arith.constant 0 : index
    %20 = vector.load %arg7[%c0_17, %c0_18] : memref<128x128xf32, #tpu.memory_space<vmem>>, vector<128x128xf32>
    tpu.vector_store %arg7[%c0_17, %c0_18], %19 {strides = array<i32>} : memref<128x128xf32, #tpu.memory_space<vmem>>, vector<128x128xf32>,
    return
  }
}

</mosaic_0001>

<bundles_post_ra>
// kernel: critic_forward.1
= control target key start
LH: loop header
LB: loop body
LE: loop exit
PB: predicated region body
PF: predicated region fallthrough
CT: control target
= control target key end

     0   :  { %12 = vsyncpa [#allocation3], 0  ;;  %s5313_s24 = smov [#allocation2]   ;;  %s7526_s0 = inlined_call_operand.vmem [shape: f32[128,32], index: 0, kind: input, shape index: {}]   ;;  %s7527_s1 = inlined_call_operand.vmem [shape: f32[32,128], index: 1, kind: input, shape index: {}]   ;;  %s7528_s2 = inlined_call_operand.vmem [shape: f32[1,128], index: 2, kind: input, shape index: {}]   ;;  %s7529_s3 = inlined_call_operand.vmem [shape: f32[128,128], index: 3, kind: input, shape index: {}]   ;;  %s7530_s4 = inlined_call_operand.vmem [shape: f32[1,128], index: 4, kind: input, shape index: {}]   ;;  %s7531_s5 = inlined_call_operand.hbm [shape: f32[128,128], index: 5, kind: input, shape index: {}]   ;;  %s7532_s6 = inlined_call_operand.vmem [shape: f32[1,128], index: 6, kind: input, shape index: {}]   ;;  %s7533_s7 = inlined_call_operand.vmem [shape: f32[128,128], index: 7, kind: output, shape index: {}]  }
   0x1   :  { %s28_s25 = sshll.u32 %s5313_s24, 4  ;;  %s29_s25 = int_to_ptr.vmem [resolvable:$true] %s28_s25 }
   0x2   :  { %s5299_s26 = scalar_lea.vmem %s29_s25, 2048  ;;  %p5304_p1 = scmp.lt.s32.totalorder %s29_s25, %s29_s25 }
   0x3   :  { %p5300_p0 = scmp.ne.s32.totalorder %s29_s25, %s5299_s26  ;;  %p5305_p2 = scmp.lt.s32.totalorder %s5299_s26, %s5299_s26 }
   0x5   :  { %p5306_p3 = por %p5305_p2, %p5304_p1 }
   0x7   :  { %p5307_p4 = pnand %p5306_p3, %p5300_p0 }
   0x9   :  { %5310 = shalt.err (!%p5307_p4)
}
   0xa   :  { %s5314_s27 = smov 128   ;;  %s5315_s28 = smov 8  }
   0xb   :  { %34 = dma.hbm_to_vmem [thread:$0]  %s7531_s5, 2048, %s29_s25, [#allocation3], %s5314_s27, %s5314_s27, %s5315_s28  }
   0xc   :  { %5311 = dma.done.wait [#allocation3], 2048  }
   0xd   :  { %5312 = vsyncadd [#allocation3], 4294965248  ;;  %vm67_vm0 = vcmask 261120   ;;  %v59_v0 = vld [vmem:[%s7527_s1 + $0x18] sm:$0xff]  ;;  %v58_v1 = vld [vmem:[%s7527_s1 + $0x10] sm:$0xff] }
   0xe   :  { %v57_v2 = vld [vmem:[%s7527_s1 + $0x8] sm:$0xff]  ;;  %v5368_v3 = vand.u32 4294901760, %v59_v0  ;;  %v5370_v4 = vand.u32 4294901760, %v58_v1  ;;  %v56_v6 = vld [vmem:[%s7527_s1] sm:$0xff]  ;;  %v42_v12 = vld [vmem:[%s7526_s0 + $0x10] sm:$0xff] }
   0xf   :  { %v5372_v5 = vand.u32 4294901760, %v57_v2  ;;  %v40_v7 = vld [vmem:[%s7526_s0] sm:$0xff]  ;;  %v41_v8 = vld [vmem:[%s7526_s0 + $0x8] sm:$0xff]  ;;  %v5383_v9 = vand.u32 4294901760, %v56_v6  ;;  %v43_v13 = vld [vmem:[%s7526_s0 + $0x18] sm:$0xff]  ;;  %v75_v19 = vsel %vm67_vm0, %v42_v12, 0 }
  0x10   :  { %v69_v10 = vsel %vm67_vm0, %v40_v7, 0  ;;  %v72_v11 = vsel %vm67_vm0, %v41_v8, 0  ;;  %4424 = vmatprep.subr.mxu0 %v5368_v3  ;;  %v5395_v14 = vsub.f32 %v59_v0, %v5368_v3  ;;  %v5402_v17 = vsub.f32 %v58_v1, %v5370_v4  ;;  %v44_v38 = vld [vmem:[%s7526_s0 + $0x20] sm:$0xff]  ;;  %v45_v39 = vld [vmem:[%s7526_s0 + $0x28] sm:$0xff]  ;;  %v46_v44 = vld [vmem:[%s7526_s0 + $0x30] sm:$0xff] }
  0x11   :  { %v5397_v15 = vand.u32 4294901760, %v69_v10  ;;  %v5399_v16 = vand.u32 4294901760, %v72_v11  ;;  %4425 = vmatpush3.msra.mxu0 %v5368_v3  ;;  %v5406_v18 = vsub.f32 %v57_v2, %v5372_v5  ;;  %v78_v20 = vsel %vm67_vm0, %v43_v13, 0  ;;  %v47_v45 = vld [vmem:[%s7526_s0 + $0x38] sm:$0xff]  ;;  %v48_v50 = vld [vmem:[%s7526_s0 + $0x40] sm:$0xff]  ;;  %v49_v51 = vld [vmem:[%s7526_s0 + $0x48] sm:$0xff] }
  0x12   :  { %v5411_v21 = vsub.f32 %v56_v6, %v5383_v9  ;;  %4426 = vmatprep.subr.mxu0 %v5370_v4  ;;  %v5415_v22 = vand.u32 4294901760, %v5395_v14  ;;  %v5424_v25 = vand.u32 4294901760, %v5402_v17  ;;  %v5431_v27 = vand.u32 4294901760, %v75_v19  ;;  %v50_v0 = vld [vmem:[%s7526_s0 + $0x50] sm:$0xff]  ;;  %v51_v1 = vld [vmem:[%s7526_s0 + $0x58] sm:$0xff] }
  0x13   :  { %v5418_v23 = vsub.f32 %v69_v10, %v5397_v15  ;;  %v5421_v24 = vsub.f32 %v72_v11, %v5399_v16  ;;  %4464 = vmatprep.mubr.f32.mxu1 %v5397_v15  ;;  %4427 = vmatpush3.msra.mxu0 %v5370_v4  ;;  %v5429_v26 = vand.u32 4294901760, %v5406_v18  ;;  %v5433_v28 = vand.u32 4294901760, %v78_v20 }
  0x14   :  { %v5436_v29 = vand.u32 4294901760, %v5411_v21  ;;  %4428 = vmatprep.subr.mxu0 %v5372_v5  ;;  %v373_v30 = vsub.f32 %v5395_v14, %v5415_v22  ;;  %v380_v33 = vsub.f32 %v5402_v17, %v5424_v25  ;;  %v5449_v35 = vsub.f32 %v75_v19, %v5431_v27 }
  0x15   :  { %v187_v31 = vand.u32 4294901760, %v5418_v23  ;;  %v197_v32 = vand.u32 4294901760, %v5421_v24  ;;  %4429 = vmatpush3.msra.mxu0 %v5372_v5  ;;  %v387_v34 = vsub.f32 %v5406_v18, %v5429_v26  ;;  %v5452_v36 = vsub.f32 %v78_v20, %v5433_v28 }
  0x16   :  { %v394_v37 = vsub.f32 %v5411_v21, %v5436_v29  ;;  %4430 = vmatprep.subr.mxu0 %v5383_v9  ;;  %v374_v40 = vand.u32 4294901760, %v373_v30  ;;  %v381_v43 = vand.u32 4294901760, %v380_v33  ;;  %v207_v47 = vand.u32 4294901760, %v5449_v35 }
  0x17   :  { %v188_v41 = vsub.f32 %v5418_v23, %v187_v31  ;;  %v198_v42 = vsub.f32 %v5421_v24, %v197_v32  ;;  %4431 = vmatpush3.msra.mxu0 %v5383_v9  ;;  %v388_v46 = vand.u32 4294901760, %v387_v34  ;;  %v217_v48 = vand.u32 4294901760, %v5452_v36 }
  0x18   :  { %v395_v49 = vand.u32 4294901760, %v394_v37  ;;  %4456 = vmatprep.subr.mxu1 %v374_v40  ;;  %4488 = vmatprep.subr.mxu0 %v5395_v14  ;;  %v81_v54 = vsel %vm67_vm0, %v44_v38, 0  ;;  %v84_v55 = vsel %vm67_vm0, %v45_v39, 0  ;;  %v208_v56 = vsub.f32 %v5449_v35, %v207_v47 }
  0x19   :  { %v189_v52 = vand.u32 4294901760, %v188_v41  ;;  %v199_v53 = vand.u32 4294901760, %v198_v42  ;;  %4457 = vmatpush3.msra.mxu1 %v374_v40  ;;  %v218_v57 = vsub.f32 %v5452_v36, %v217_v48  ;;  %v5493_v58 = vand.u32 4294901760, %v81_v54 }
  0x1a   :  { %v5495_v59 = vand.u32 4294901760, %v84_v55  ;;  %4458 = vmatprep.subr.mxu1 %v381_v43  ;;  %v87_v60 = vsel %vm67_vm0, %v46_v44, 0  ;;  %v90_v61 = vsel %vm67_vm0, %v47_v45, 0  ;;  %v93_v62 = vsel %vm67_vm0, %v48_v50, 0  ;;  %v53_v50 = vld [vmem:[%s7526_s0 + $0x68] sm:$0xff] }
  0x1b   :  { %4432 = vmatprep.mubr.f32.mxu0 %v189_v52  ;;  %v96_v63 = vsel %vm67_vm0, %v49_v51, 0  ;;  %4459 = vmatpush3.msra.mxu1 %v381_v43  ;;  %v209_v2 = vand.u32 4294901760, %v208_v56  ;;  %v219_v6 = vand.u32 4294901760, %v218_v57  ;;  %v5508_v7 = vsub.f32 %v81_v54, %v5493_v58 }
  0x1c   :  { %4433 = vmatmul.mubr.f32.vlgmr.msra.gmra.mxu0 %v199_v53  ;;  %v5511_v8 = vsub.f32 %v84_v55, %v5495_v59  ;;  %4460 = vmatprep.subr.mxu1 %v388_v46  ;;  %v5514_v10 = vand.u32 4294901760, %v87_v60  ;;  %v5516_v11 = vand.u32 4294901760, %v90_v61  ;;  %v5518_v12 = vand.u32 4294901760, %v93_v62 }
  0x1d   :  { %4489 = vmatpush3.msra.mxu0 %v5395_v14  ;;  %v5520_v13 = vand.u32 4294901760, %v96_v63  ;;  %4435 = vmatprep.mubr.f32.mxu0 %v209_v2  ;;  %v227_v19 = vand.u32 4294901760, %v5508_v7  ;;  %v99_v30 = vsel %vm67_vm0, %v50_v0, 0  ;;  %v102_v33 = vsel %vm67_vm0, %v51_v1, 0 }
  0x1e   :  { %4461 = vmatpush3.msra.mxu1 %v388_v46  ;;  %v237_v20 = vand.u32 4294901760, %v5511_v8  ;;  %v5527_v14 = vsub.f32 %v87_v60, %v5514_v10  ;;  %v5530_v34 = vsub.f32 %v90_v61, %v5516_v11  ;;  %4490 = vmatprep.subr.mxu0 %v5402_v17  ;;  %v5534_v37 = vsub.f32 %v93_v62, %v5518_v12 }
  0x1f   :  { %4462 = vmatprep.subr.mxu1 %v395_v49  ;;  %v5536_v38 = vand.u32 4294901760, %v99_v30  ;;  %v228_v39 = vsub.f32 %v5508_v7, %v227_v19  ;;  %v5545_v41 = vsub.f32 %v96_v63, %v5520_v13  ;;  %v5547_v42 = vand.u32 4294901760, %v102_v33  ;;  %4491 = vmatpush3.msra.mxu0 %v5402_v17  ;;  %v54_v63 = vld [vmem:[%s7526_s0 + $0x70] sm:$0xff]  ;;  %v55_v17 = vld [vmem:[%s7526_s0 + $0x78] sm:$0xff] }
  0x20   :  { %4436 = vmatmul.mubr.f32.gmra.mxu0 %v219_v6  ;;  %4463 = vmatpush3.msra.mxu1 %v395_v49  ;;  %v238_v40 = vsub.f32 %v5511_v8, %v237_v20  ;;  %v247_v43 = vand.u32 4294901760, %v5527_v14  ;;  %v257_v44 = vand.u32 4294901760, %v5530_v34  ;;  %v267_v45 = vand.u32 4294901760, %v5534_v37  ;;  %v52_v49 = vld [vmem:[%s7526_s0 + $0x60] sm:$0xff] }
  0x21   :  { %4465 = vmatmul.mubr.f32.vlgmr.msra.gmra.mxu1 %v5399_v16  ;;  %4520 = vmatprep.subr.mxu1 %v5368_v3  ;;  %v5555_v46 = vsub.f32 %v99_v30, %v5536_v38  ;;  %v229_v51 = vand.u32 4294901760, %v228_v39  ;;  %v277_v53 = vand.u32 4294901760, %v5545_v41  ;;  %v5567_v54 = vsub.f32 %v102_v33, %v5547_v42 }
  0x22   :  { %4521 = vmatpush3.msra.mxu1 %v5368_v3  ;;  %v239_v52 = vand.u32 4294901760, %v238_v40  ;;  %4467 = vmatprep.mubr.f32.mxu1 %v5431_v27  ;;  %v248_v55 = vsub.f32 %v5527_v14, %v247_v43  ;;  %v258_v56 = vsub.f32 %v5530_v34, %v257_v44  ;;  %v268_v57 = vsub.f32 %v5534_v37, %v267_v45 }
  0x23   :  { %4522 = vmatprep.subr.mxu1 %v5370_v4  ;;  %v287_v60 = vand.u32 4294901760, %v5555_v46  ;;  %4438 = vmatprep.mubr.f32.mxu0 %v229_v51  ;;  %v105_v61 = vsel %vm67_vm0, %v52_v49, 0  ;;  %v108_v62 = vsel %vm67_vm0, %v53_v50, 0  ;;  %v278_v2 = vsub.f32 %v5545_v41, %v277_v53 }
  0x24   :  { %4523 = vmatpush3.msra.mxu1 %v5370_v4  ;;  %4439 = vmatmul.mubr.f32.gmra.mxu0 %v239_v52  ;;  %v249_v0 = vand.u32 4294901760, %v248_v55  ;;  %v259_v1 = vand.u32 4294901760, %v258_v56  ;;  %v297_v6 = vand.u32 4294901760, %v5567_v54  ;;  %v269_v30 = vand.u32 4294901760, %v268_v57 }
  0x25   :  { %4468 = vmatmul.mubr.f32.gmra.mxu1 %v5433_v28  ;;  %v288_v33 = vsub.f32 %v5555_v46, %v287_v60  ;;  %4492 = vmatprep.subr.mxu0 %v5406_v18  ;;  %v5600_v39 = vand.u32 4294901760, %v105_v61  ;;  %v5602_v40 = vand.u32 4294901760, %v108_v62  ;;  %v111_v49 = vsel %vm67_vm0, %v54_v63, 0 }
  0x26   :  { %4470 = vmatprep.mubr.f32.mxu1 %v5493_v58  ;;  %4441 = vmatprep.mubr.f32.mxu0 %v249_v0  ;;  %v114_v50 = vsel %vm67_vm0, %v55_v17, 0  ;;  %v5614_v55 = vand.u32 4294901760, %v111_v49  ;;  %v298_v56 = vsub.f32 %v5567_v54, %v297_v6 }
  0x27   :  { %4493 = vmatpush3.msra.mxu0 %v5406_v18  ;;  %4524 = vmatprep.subr.mxu1 %v5372_v5  ;;  %v5609_v51 = vsub.f32 %v105_v61, %v5600_v39  ;;  %v5612_v52 = vsub.f32 %v108_v62, %v5602_v40  ;;  %v279_v18 = vand.u32 4294901760, %v278_v2  ;;  %v5621_v57 = vand.u32 4294901760, %v114_v50 }
  0x28   :  { %4494 = vmatprep.subr.mxu0 %v5411_v21  ;;  %4442 = vmatmul.mubr.f32.gmra.mxu0 %v259_v1  ;;  %v289_v61 = vand.u32 4294901760, %v288_v33  ;;  %v5627_v17 = vsub.f32 %v111_v49, %v5614_v55 }
  0x29   :  { %4471 = vmatmul.mubr.f32.gmra.mxu1 %v5495_v59  ;;  %4444 = vmatprep.mubr.f32.mxu0 %v269_v30  ;;  %v307_v62 = vand.u32 4294901760, %v5609_v51  ;;  %v317_v63 = vand.u32 4294901760, %v5612_v52  ;;  %v5631_v0 = vsub.f32 %v114_v50, %v5621_v57  ;;  %v299_v30 = vand.u32 4294901760, %v298_v56 }
  0x2a   :  { %4473 = vmatprep.mubr.f32.mxu1 %v5514_v10  ;;  %4525 = vmatpush3.msra.mxu1 %v5372_v5  ;;  %v327_v2 = vand.u32 4294901760, %v5627_v17 }
  0x2b   :  { %4495 = vmatpush3.msra.mxu0 %v5411_v21  ;;  %v308_v1 = vsub.f32 %v5609_v51, %v307_v62  ;;  %4526 = vmatprep.subr.mxu1 %v5383_v9  ;;  %v318_v33 = vsub.f32 %v5612_v52, %v317_v63  ;;  %v337_v21 = vand.u32 4294901760, %v5631_v0 }
  0x2c   :  { %4552 = vmatprep.subr.mxu0 %v5415_v22  ;;  %4445 = vmatmul.mubr.f32.gmra.mxu0 %v279_v18  ;;  %v328_v50 = vsub.f32 %v5627_v17, %v327_v2 }
  0x2d   :  { %4474 = vmatmul.mubr.f32.gmra.mxu1 %v5516_v11  ;;  %4447 = vmatprep.mubr.f32.mxu0 %v289_v61  ;;  %v309_v49 = vand.u32 4294901760, %v308_v1  ;;  %v319_v18 = vand.u32 4294901760, %v318_v33  ;;  %v338_v56 = vsub.f32 %v5631_v0, %v337_v21  ;;  %v1266_v33 = vld [vmem:[%s7529_s3 + $0x20] sm:$0xff] }
  0x2e   :  { %4476 = vmatprep.mubr.f32.mxu1 %v5518_v12  ;;  %4527 = vmatpush3.msra.mxu1 %v5383_v9  ;;  %v329_v61 = vand.u32 4294901760, %v328_v50 }
  0x2f   :  { %4584 = vmatprep.subr.mxu1 %v5368_v3  ;;  %v339_v1 = vand.u32 4294901760, %v338_v56 }
  0x30   :  { %4448 = vmatmul.mubr.f32.gmra.mxu0 %v299_v30 }
  0x31   :  { %4477 = vmatmul.mubr.f32.gmra.mxu1 %v5520_v13  ;;  %4450 = vmatprep.mubr.f32.mxu0 %v309_v49 }
  0x32   :  { %4479 = vmatprep.mubr.f32.mxu1 %v5536_v38 }
  0x34   :  { %4451 = vmatmul.mubr.f32.gmra.mxu0 %v319_v18  ;;  %v5910_v18 = vand.u32 4294901760, %v1266_v33 }
  0x35   :  { %4480 = vmatmul.mubr.f32.gmra.mxu1 %v5547_v42  ;;  %4453 = vmatprep.mubr.f32.mxu0 %v329_v61  ;;  %v1265_v61 = vld [vmem:[%s7529_s3 + $0x18] sm:$0xff] }
  0x36   :  { %4482 = vmatprep.mubr.f32.mxu1 %v5600_v39  ;;  %7760 = vst [vmem:[#allocation33_spill] sm:$0xff] %v5910_v18 }
  0x38   :  { %4454 = vmatmul.mubr.f32.gmra.mxu0 %v339_v1 }
  0x39   :  { %4483 = vmatmul.mubr.f32.gmra.mxu1 %v5602_v40  ;;  %4496 = vmatprep.mubr.f32.mxu0 %v5418_v23 }
  0x3a   :  { %4485 = vmatprep.mubr.f32.mxu1 %v5614_v55 }
  0x3c   :  { %4497 = vmatmul.mubr.f32.vlgmr.msra.gmra.mxu0 %v5421_v24 }
  0x3d   :  { %4486 = vmatmul.mubr.f32.gmra.mxu1 %v5621_v57  ;;  %4499 = vmatprep.mubr.f32.mxu0 %v5449_v35 }
  0x3e   :  { %4528 = vmatprep.mubr.f32.mxu1 %v187_v31  ;;  %4553 = vmatpush3.msra.mxu0 %v5415_v22  ;;  %v1273_v31 = vld [vmem:[%s7529_s3 + $0x58] sm:$0xff] }
  0x3f   :  { %4554 = vmatprep.subr.mxu0 %v5424_v25 }
  0x40   :  { %4500 = vmatmul.mubr.f32.gmra.mxu0 %v5452_v36 }
  0x41   :  { %4529 = vmatmul.mubr.f32.vlgmr.msra.gmra.mxu1 %v197_v32  ;;  %4502 = vmatprep.mubr.f32.mxu0 %v5508_v7 }
  0x42   :  { %4585 = vmatpush3.msra.mxu1 %v5368_v3  ;;  %4531 = vmatprep.mubr.f32.mxu1 %v207_v47  ;;  %v1277_v3 = vld [vmem:[%s7529_s3 + $0x78] sm:$0xff] }
  0x43   :  { %4555 = vmatpush3.msra.mxu0 %v5424_v25  ;;  %4586 = vmatprep.subr.mxu1 %v5370_v4  ;;  %v1274_v25 = vld [vmem:[%s7529_s3 + $0x60] sm:$0xff] }
  0x44   :  { %4556 = vmatprep.subr.mxu0 %v5429_v26  ;;  %4503 = vmatmul.mubr.f32.gmra.mxu0 %v5511_v8 }
  0x45   :  { %4532 = vmatmul.mubr.f32.gmra.mxu1 %v217_v48  ;;  %4505 = vmatprep.mubr.f32.mxu0 %v5527_v14  ;;  %v5810_v48 = vand.u32 4294901760, %v1273_v31 }
  0x46   :  { %4534 = vmatprep.mubr.f32.mxu1 %v227_v19  ;;  %4587 = vmatpush3.msra.mxu1 %v5370_v4  ;;  %v5758_v4 = vand.u32 4294901760, %v1277_v3 }
  0x47   :  { %4557 = vmatpush3.msra.mxu0 %v5429_v26  ;;  %4588 = vmatprep.subr.mxu1 %v5372_v5  ;;  %7740 = vst [vmem:[#allocation13_spill] sm:$0xff] %v5810_v48 }
  0x48   :  { %4558 = vmatprep.subr.mxu0 %v5436_v29  ;;  %4506 = vmatmul.mubr.f32.gmra.mxu0 %v5530_v34 }
  0x49   :  { %4535 = vmatmul.mubr.f32.gmra.mxu1 %v237_v20  ;;  %4508 = vmatprep.mubr.f32.mxu0 %v5534_v37  ;;  %v1270_v37 = vld [vmem:[%s7529_s3 + $0x40] sm:$0xff] }
  0x4a   :  { %4537 = vmatprep.mubr.f32.mxu1 %v247_v43  ;;  %4589 = vmatpush3.msra.mxu1 %v5372_v5  ;;  %v1276_v5 = vld [vmem:[%s7529_s3 + $0x70] sm:$0xff]  ;;  %v5851_v43 = vand.u32 4294901760, %v1270_v37 }
  0x4b   :  { %4559 = vmatpush3.msra.mxu0 %v5436_v29  ;;  %4590 = vmatprep.subr.mxu1 %v5383_v9  ;;  %v5794_v29 = vand.u32 4294901760, %v1274_v25 }
  0x4c   :  { %4509 = vmatmul.mubr.f32.gmra.mxu0 %v5545_v41  ;;  %4591 = vmatpush3.msra.mxu1 %v5383_v9  ;;  %v5764_v9 = vsub.f32 %v1277_v3, %v5758_v4  ;;  %7749 = vst [vmem:[#allocation22_spill] sm:$0xff] %v5851_v43 }
  0x4d   :  { %4538 = vmatmul.mubr.f32.gmra.mxu1 %v257_v44  ;;  %4511 = vmatprep.mubr.f32.mxu0 %v5555_v46  ;;  %7737 = vst [vmem:[#allocation10_spill] sm:$0xff] %v5794_v29  ;;  %v5807_v47 = vsub.f32 %v1274_v25, %v5794_v29 }
  0x4e   :  { %4540 = vmatprep.mubr.f32.mxu1 %v267_v45  ;;  %7732 = vst [vmem:[#allocation5_spill] sm:$0xff] %v5764_v9  ;;  %4616 = vmatprep.subr.mxu0 %v5758_v4  ;;  %v5774_v22 = vand.u32 4294901760, %v5764_v9  ;;  %v1269_v45 = vld [vmem:[%s7529_s3 + $0x38] sm:$0xff] }
  0x4f   :  { %7739 = vst [vmem:[#allocation12_spill] sm:$0xff] %v5807_v47  ;;  %v5819_v8 = vand.u32 4294901760, %v5807_v47 }
  0x50   :  { %4512 = vmatmul.mubr.f32.gmra.mxu0 %v5567_v54  ;;  %7733 = vst [vmem:[#allocation6_spill] sm:$0xff] %v5774_v22  ;;  %v1530_v26 = vsub.f32 %v5764_v9, %v5774_v22  ;;  %v5866_v54 = vsub.f32 %v1270_v37, %v5851_v43 }
  0x51   :  { %4541 = vmatmul.mubr.f32.gmra.mxu1 %v277_v53  ;;  %4514 = vmatprep.mubr.f32.mxu0 %v5609_v51  ;;  %7741 = vst [vmem:[#allocation14_spill] sm:$0xff] %v5819_v8  ;;  %v1551_v19 = vsub.f32 %v5807_v47, %v5819_v8 }
  0x52   :  { %4543 = vmatprep.mubr.f32.mxu1 %v287_v60  ;;  %v1531_v32 = vand.u32 4294901760, %v1530_v26  ;;  %7751 = vst [vmem:[#allocation24_spill] sm:$0xff] %v5866_v54  ;;  %v5868_v60 = vand.u32 4294901760, %v1269_v45  ;;  %v1264_v26 = vld [vmem:[%s7529_s3 + $0x10] sm:$0xff] }
  0x54   :  { %4515 = vmatmul.mubr.f32.gmra.mxu0 %v5612_v52  ;;  %4672 = vmatprep.subr.mxu1 %v1531_v32  ;;  %7752 = vst [vmem:[#allocation25_spill] sm:$0xff] %v5868_v60  ;;  %v5878_v52 = vand.u32 4294901760, %v5866_v54 }
  0x55   :  { %4544 = vmatmul.mubr.f32.gmra.mxu1 %v297_v6  ;;  %4517 = vmatprep.mubr.f32.mxu0 %v5627_v17 }
  0x56   :  { %4546 = vmatprep.mubr.f32.mxu1 %v307_v62  ;;  %7753 = vst [vmem:[#allocation26_spill] sm:$0xff] %v5878_v52  ;;  %v1267_v62 = vld [vmem:[%s7529_s3 + $0x28] sm:$0xff]  ;;  %v1579_v17 = vsub.f32 %v5866_v54, %v5878_v52 }
  0x58   :  { %4518 = vmatmul.mubr.f32.gmra.mxu0 %v5631_v0 }
  0x59   :  { %4547 = vmatmul.mubr.f32.gmra.mxu1 %v317_v63  ;;  %4560 = vmatprep.mubr.f32.mxu0 %v5397_v15 }
  0x5a   :  { %4549 = vmatprep.mubr.f32.mxu1 %v327_v2  ;;  %v5895_v2 = vand.u32 4294901760, %v1267_v62 }
  0x5c   :  { %4561 = vmatmul.mubr.f32.vlgmr.msra.gmra.mxu0 %v5399_v16  ;;  %7757 = vst [vmem:[#allocation30_spill] sm:$0xff] %v5895_v2  ;;  %v5908_v50 = vsub.f32 %v1267_v62, %v5895_v2 }
  0x5d   :  { %4550 = vmatmul.mubr.f32.gmra.mxu1 %v337_v21  ;;  %4563 = vmatprep.mubr.f32.mxu0 %v5431_v27  ;;  %v1580_v21 = vand.u32 4294901760, %v1579_v17 }
  0x5e   :  { %4592 = vmatprep.mubr.f32.mxu1 %v5397_v15  ;;  %v5766_v15 = vand.u32 4294901760, %v1276_v5  ;;  %4617 = vmatpush3.msra.mxu0 %v5758_v4  ;;  %7759 = vst [vmem:[#allocation32_spill] sm:$0xff] %v5908_v50  ;;  %v5921_v3 = vand.u32 4294901760, %v5908_v50 }
  0x60   :  { %4564 = vmatmul.mubr.f32.gmra.mxu0 %v5433_v28  ;;  %v5777_v23 = vsub.f32 %v1276_v5, %v5766_v15  ;;  %4618 = vmatprep.subr.mxu0 %v5766_v15  ;;  %7762 = vst [vmem:[#allocation35_spill] sm:$0xff] %v5921_v3  ;;  %v5924_v5 = vsub.f32 %v1266_v33, %v5910_v18 }
  0x61   :  { %4593 = vmatmul.mubr.f32.vlgmr.msra.gmra.mxu1 %v5399_v16  ;;  %4566 = vmatprep.mubr.f32.mxu0 %v5493_v58  ;;  %v1275_v16 = vld [vmem:[%s7529_s3 + $0x68] sm:$0xff] }
  0x62   :  { %4595 = vmatprep.mubr.f32.mxu1 %v5431_v27  ;;  %7734 = vst [vmem:[#allocation7_spill] sm:$0xff] %v5777_v23  ;;  %v5779_v24 = vand.u32 4294901760, %v1275_v16  ;;  %4619 = vmatpush3.msra.mxu0 %v5766_v15  ;;  %v5789_v27 = vand.u32 4294901760, %v5777_v23  ;;  %7763 = vst [vmem:[#allocation36_spill] sm:$0xff] %v5924_v5 }
  0x63   :  { %4673 = vmatpush3.msra.mxu1 %v1531_v32  ;;  %v5938_v32 = vand.u32 4294901760, %v5924_v5 }
  0x64   :  { %4567 = vmatmul.mubr.f32.gmra.mxu0 %v5495_v59  ;;  %7735 = vst [vmem:[#allocation8_spill] sm:$0xff] %v5789_v27  ;;  %4620 = vmatprep.subr.mxu0 %v5779_v24  ;;  %v1537_v35 = vsub.f32 %v5777_v23, %v5789_v27 }
  0x65   :  { %4596 = vmatmul.mubr.f32.gmra.mxu1 %v5433_v28  ;;  %4569 = vmatprep.mubr.f32.mxu0 %v5514_v10  ;;  %v5792_v28 = vsub.f32 %v1275_v16, %v5779_v24  ;;  %v5926_v16 = vand.u32 4294901760, %v1265_v61  ;;  %7765 = vst [vmem:[#allocation38_spill] sm:$0xff] %v5938_v32 }
  0x66   :  { %4598 = vmatprep.mubr.f32.mxu1 %v5493_v58  ;;  %4621 = vmatpush3.msra.mxu0 %v5779_v24  ;;  %v1272_v58 = vld [vmem:[%s7529_s3 + $0x50] sm:$0xff] }
  0x67   :  { %7736 = vst [vmem:[#allocation9_spill] sm:$0xff] %v5792_v28  ;;  %v5804_v36 = vand.u32 4294901760, %v5792_v28  ;;  %4622 = vmatprep.subr.mxu0 %v5794_v29  ;;  %7764 = vst [vmem:[#allocation37_spill] sm:$0xff] %v5926_v16 }
  0x68   :  { %4570 = vmatmul.mubr.f32.gmra.mxu0 %v5516_v11 }
  0x69   :  { %4599 = vmatmul.mubr.f32.gmra.mxu1 %v5495_v59  ;;  %4572 = vmatprep.mubr.f32.mxu0 %v5518_v12  ;;  %7738 = vst [vmem:[#allocation11_spill] sm:$0xff] %v5804_v36  ;;  %v1538_v59 = vand.u32 4294901760, %v1537_v35  ;;  %v1544_v7 = vsub.f32 %v5792_v28, %v5804_v36  ;;  %v5941_v35 = vsub.f32 %v1265_v61, %v5926_v16 }
  0x6a   :  { %4601 = vmatprep.mubr.f32.mxu1 %v5514_v10  ;;  %4623 = vmatpush3.msra.mxu0 %v5794_v29  ;;  %v5821_v10 = vand.u32 4294901760, %v1272_v58 }
  0x6b   :  { %4624 = vmatprep.subr.mxu0 %v5810_v48  ;;  %4674 = vmatprep.subr.mxu1 %v1538_v59  ;;  %7766 = vst [vmem:[#allocation39_spill] sm:$0xff] %v5941_v35 }
  0x6c   :  { %4573 = vmatmul.mubr.f32.gmra.mxu0 %v5520_v13  ;;  %7742 = vst [vmem:[#allocation15_spill] sm:$0xff] %v5821_v10  ;;  %v5833_v20 = vsub.f32 %v1272_v58, %v5821_v10  ;;  %4675 = vmatpush3.msra.mxu1 %v1538_v59  ;;  %v5943_v58 = vand.u32 4294901760, %v1264_v26 }
  0x6d   :  { %4602 = vmatmul.mubr.f32.gmra.mxu1 %v5516_v11  ;;  %4575 = vmatprep.mubr.f32.mxu0 %v5536_v38  ;;  %v5824_v11 = vsub.f32 %v1273_v31, %v5810_v48  ;;  %v1600_v31 = vsub.f32 %v5908_v50, %v5921_v3 }
  0x6e   :  { %4604 = vmatprep.mubr.f32.mxu1 %v5518_v12  ;;  %v1271_v12 = vld [vmem:[%s7529_s3 + $0x48] sm:$0xff]  ;;  %7744 = vst [vmem:[#allocation17_spill] sm:$0xff] %v5833_v20  ;;  %4625 = vmatpush3.msra.mxu0 %v5810_v48  ;;  %v5846_v41 = vand.u32 4294901760, %v5833_v20  ;;  %7767 = vst [vmem:[#allocation40_spill] sm:$0xff] %v5943_v58  ;;  %v5956_v37 = vsub.f32 %v1264_v26, %v5943_v58 }
  0x6f   :  { %7743 = vst [vmem:[#allocation16_spill] sm:$0xff] %v5824_v11  ;;  %v5835_v14 = vand.u32 4294901760, %v1271_v12  ;;  %v5839_v34 = vand.u32 4294901760, %v5824_v11  ;;  %4626 = vmatprep.subr.mxu0 %v5821_v10 }
  0x70   :  { %4576 = vmatmul.mubr.f32.gmra.mxu0 %v5547_v42  ;;  %7747 = vst [vmem:[#allocation20_spill] sm:$0xff] %v5846_v41  ;;  %v1565_v46 = vsub.f32 %v5833_v20, %v5846_v41  ;;  %7769 = vst [vmem:[#allocation42_spill] sm:$0xff] %v5956_v37 }
  0x71   :  { %4605 = vmatmul.mubr.f32.gmra.mxu1 %v5520_v13  ;;  %4578 = vmatprep.mubr.f32.mxu0 %v5600_v39  ;;  %v1545_v13 = vand.u32 4294901760, %v1544_v7  ;;  %7745 = vst [vmem:[#allocation18_spill] sm:$0xff] %v5835_v14  ;;  %7746 = vst [vmem:[#allocation19_spill] sm:$0xff] %v5839_v34  ;;  %v1558_v44 = vsub.f32 %v5824_v11, %v5839_v34  ;;  %v1263_v7 = vld [vmem:[%s7529_s3 + $0x8] sm:$0xff] }
  0x72   :  { %4607 = vmatprep.mubr.f32.mxu1 %v5536_v38  ;;  %v1552_v38 = vand.u32 4294901760, %v1551_v19  ;;  %4627 = vmatpush3.msra.mxu0 %v5821_v10  ;;  %v5953_v19 = vand.u32 4294901760, %v5941_v35 }
  0x73   :  { %4676 = vmatprep.subr.mxu1 %v1545_v13  ;;  %4628 = vmatprep.subr.mxu0 %v5835_v14  ;;  %v1559_v6 = vand.u32 4294901760, %v1558_v44  ;;  %v1262_v44 = vld [vmem:[%s7529_s3] sm:$0xff] }
  0x74   :  { %4579 = vmatmul.mubr.f32.gmra.mxu0 %v5602_v40  ;;  %4677 = vmatpush3.msra.mxu1 %v1545_v13  ;;  %v1607_v13 = vsub.f32 %v5924_v5, %v5938_v32  ;;  %7768 = vst [vmem:[#allocation41_spill] sm:$0xff] %v5953_v19 }
  0x75   :  { %4608 = vmatmul.mubr.f32.gmra.mxu1 %v5547_v42  ;;  %4581 = vmatprep.mubr.f32.mxu0 %v5614_v55  ;;  %v5849_v42 = vsub.f32 %v1271_v12, %v5835_v14  ;;  %v1601_v12 = vand.u32 4294901760, %v1600_v31 }
  0x76   :  { %4610 = vmatprep.mubr.f32.mxu1 %v5600_v39  ;;  %4678 = vmatprep.subr.mxu1 %v1552_v38  ;;  %v1268_v39 = vld [vmem:[%s7529_s3 + $0x30] sm:$0xff] }
  0x77   :  { %7748 = vst [vmem:[#allocation21_spill] sm:$0xff] %v5849_v42  ;;  %v5863_v53 = vand.u32 4294901760, %v5849_v42  ;;  %4629 = vmatpush3.msra.mxu0 %v5835_v14  ;;  %4679 = vmatpush3.msra.mxu1 %v1552_v38  ;;  %v5959_v38 = vand.u32 4294901760, %v1263_v7 }
  0x78   :  { %4582 = vmatmul.mubr.f32.gmra.mxu0 %v5621_v57  ;;  %4630 = vmatprep.subr.mxu0 %v5851_v43 }
  0x79   :  { %4611 = vmatmul.mubr.f32.gmra.mxu1 %v5602_v40  ;;  %7750 = vst [vmem:[#allocation23_spill] sm:$0xff] %v5863_v53  ;;  %v1566_v40 = vand.u32 4294901760, %v1565_v46  ;;  %v1572_v51 = vsub.f32 %v5849_v42, %v5863_v53  ;;  %4631 = vmatpush3.msra.mxu0 %v5851_v43  ;;  %7770 = vst [vmem:[#allocation43_spill] sm:$0xff] %v5959_v38  ;;  %v1614_v46 = vsub.f32 %v5941_v35, %v5953_v19 }
  0x7a   :  { %4613 = vmatprep.mubr.f32.mxu1 %v5614_v55  ;;  %v5881_v55 = vsub.f32 %v1269_v45, %v5868_v60  ;;  %4680 = vmatprep.subr.mxu1 %v1559_v6  ;;  %v1608_v45 = vand.u32 4294901760, %v1607_v13 }
  0x7b   :  { %4632 = vmatprep.subr.mxu0 %v5868_v60  ;;  %4681 = vmatpush3.msra.mxu1 %v1559_v6  ;;  %v1573_v63 = vand.u32 4294901760, %v1572_v51  ;;  %v5968_v6 = vand.u32 4294901760, %v5956_v37  ;;  %v1615_v51 = vand.u32 4294901760, %v1614_v46 }
  0x7c   :  { %7754 = vst [vmem:[#allocation27_spill] sm:$0xff] %v5881_v55  ;;  %v5893_v0 = vand.u32 4294901760, %v5881_v55  ;;  %4633 = vmatpush3.msra.mxu0 %v5868_v60  ;;  %4682 = vmatprep.subr.mxu1 %v1566_v40 }
  0x7d   :  { %4614 = vmatmul.mubr.f32.gmra.mxu1 %v5621_v57  ;;  %v5884_v57 = vand.u32 4294901760, %v1268_v39  ;;  %7771 = vst [vmem:[#allocation44_spill] sm:$0xff] %v5968_v6  ;;  %v1621_v62 = vsub.f32 %v5956_v37, %v5968_v6 }
  0x7e   :  { %7756 = vst [vmem:[#allocation29_spill] sm:$0xff] %v5893_v0  ;;  %4683 = vmatpush3.msra.mxu1 %v1566_v40  ;;  %v1586_v49 = vsub.f32 %v5881_v55, %v5893_v0  ;;  %v5974_v40 = vsub.f32 %v1263_v7, %v5959_v38 }
  0x7f   :  { %7755 = vst [vmem:[#allocation28_spill] sm:$0xff] %v5884_v57  ;;  %v5899_v30 = vsub.f32 %v1268_v39, %v5884_v57  ;;  %4634 = vmatprep.subr.mxu0 %v5884_v57  ;;  %4684 = vmatprep.subr.mxu1 %v1573_v63  ;;  %v5970_v39 = vand.u32 4294901760, %v1262_v44  ;;  %v1622_v33 = vand.u32 4294901760, %v1621_v62 }
  0x80   :  { %4635 = vmatpush3.msra.mxu0 %v5884_v57  ;;  %4685 = vmatpush3.msra.mxu1 %v1573_v63  ;;  %v1587_v1 = vand.u32 4294901760, %v1586_v49  ;;  %7773 = vst [vmem:[#allocation46_spill] sm:$0xff] %v5974_v40  ;;  %v5984_v17 = vand.u32 4294901760, %v5974_v40 }
  0x81   :  { %7758 = vst [vmem:[#allocation31_spill] sm:$0xff] %v5899_v30  ;;  %v5914_v56 = vand.u32 4294901760, %v5899_v30  ;;  %4636 = vmatprep.subr.mxu0 %v5895_v2  ;;  %4686 = vmatprep.subr.mxu1 %v1580_v21  ;;  %7772 = vst [vmem:[#allocation45_spill] sm:$0xff] %v5970_v39  ;;  %v5980_v63 = vsub.f32 %v1262_v44, %v5970_v39 }
  0x82   :  { %4637 = vmatpush3.msra.mxu0 %v5895_v2  ;;  %4687 = vmatpush3.msra.mxu1 %v1580_v21  ;;  %7775 = vst [vmem:[#allocation48_spill] sm:$0xff] %v5984_v17  ;;  %v1628_v49 = vsub.f32 %v5974_v40, %v5984_v17 }
  0x83   :  { %7761 = vst [vmem:[#allocation34_spill] sm:$0xff] %v5914_v56  ;;  %v1593_v25 = vsub.f32 %v5899_v30, %v5914_v56  ;;  %4638 = vmatprep.subr.mxu0 %v5910_v18  ;;  %4688 = vmatprep.subr.mxu1 %v1587_v1  ;;  %7774 = vst [vmem:[#allocation47_spill] sm:$0xff] %v5980_v63  ;;  %v5988_v21 = vand.u32 4294901760, %v5980_v63 }
  0x84   :  { %4639 = vmatpush3.msra.mxu0 %v5910_v18  ;;  %4689 = vmatpush3.msra.mxu1 %v1587_v1  ;;  %v1629_v1 = vand.u32 4294901760, %v1628_v49 }
  0x85   :  { %v1594_v59 = vand.u32 4294901760, %v1593_v25  ;;  %4640 = vmatprep.subr.mxu0 %v5926_v16  ;;  %7776 = vst [vmem:[#allocation49_spill] sm:$0xff] %v5988_v21  ;;  %v1635_v61 = vsub.f32 %v5980_v63, %v5988_v21 }
  0x86   :  { %4641 = vmatpush3.msra.mxu0 %v5926_v16 }
  0x87   :  { %4690 = vmatprep.subr.mxu1 %v1594_v59  ;;  %4642 = vmatprep.subr.mxu0 %v5943_v58  ;;  %v1636_v25 = vand.u32 4294901760, %v1635_v61 }
  0x88   :  { %4691 = vmatpush3.msra.mxu1 %v1594_v59  ;;  %4643 = vmatpush3.msra.mxu0 %v5943_v58 }
  0x89   :  { %4692 = vmatprep.subr.mxu1 %v1601_v12  ;;  %4644 = vmatprep.subr.mxu0 %v5959_v38 }
  0x8a   :  { %4693 = vmatpush3.msra.mxu1 %v1601_v12  ;;  %4645 = vmatpush3.msra.mxu0 %v5959_v38 }
  0x8b   :  { %4694 = vmatprep.subr.mxu1 %v1608_v45  ;;  %4646 = vmatprep.subr.mxu0 %v5970_v39 }
  0x8c   :  { %4695 = vmatpush3.msra.mxu1 %v1608_v45  ;;  %4647 = vmatpush3.msra.mxu0 %v5970_v39 }
  0x8d   :  { %4696 = vmatprep.subr.mxu1 %v1615_v51  ;;  %4728 = vmatprep.subr.mxu0 %v5764_v9 }
  0x8e   :  { %4697 = vmatpush3.msra.mxu1 %v1615_v51 }
  0x8f   :  { %4698 = vmatprep.subr.mxu1 %v1622_v33 }
  0x90   :  { %4699 = vmatpush3.msra.mxu1 %v1622_v33 }
  0x91   :  { %4700 = vmatprep.subr.mxu1 %v1629_v1 }
  0x92   :  { %4701 = vmatpush3.msra.mxu1 %v1629_v1  ;;  %v6028_v1 = vld [vmem:[%s7528_s2] ss:$0 sm:$0xff] }
  0x93   :  { %4702 = vmatprep.subr.mxu1 %v1636_v25 }
  0x94   :  { %4703 = vmatpush3.msra.mxu1 %v1636_v25 }
  0x95   :  { %4784 = vmatprep.subr.mxu1 %v5758_v4 }
  0xdc   :  { %v5997_v26 = vpop.f32.mrf.mxu0 }
  0xdd   :  { %v202_v47 = vadd.f32 %v5997_v26, %v6028_v1 }
  0xde   :  { %v5999_v31 = vpop.f32.mrf.mxu0 }
  0xdf   :  { %v192_v23 = vadd.f32 %v6028_v1, %v5999_v31 }
  0xe0   :  { %v6001_v59 = vpop.f32.mrf.mxu0 }
  0xe1   :  { %v6003_v7 = vpop.f32.mrf.mxu1  ;;  %v222_v9 = vadd.f32 %v6001_v59, %v6028_v1 }
  0xe2   :  { %v6005_v12 = vpop.f32.mrf.mxu0  ;;  %v439_v48 = vadd.f32 %v6003_v7, %v202_v47 }
  0xe3   :  { %v6007_v13 = vpop.f32.mrf.mxu1 }
  0xe4   :  { %v6009_v44 = vpop.f32.mrf.mxu0 }
  0xe5   :  { %v6011_v45 = vpop.f32.mrf.mxu1  ;;  %v242_v29 = vadd.f32 %v6009_v44, %v6028_v1 }
  0xe6   :  { %v6013_v46 = vpop.f32.mrf.mxu0  ;;  %v451_v44 = vadd.f32 %v6011_v45, %v222_v9 }
  0xe7   :  { %v6015_v51 = vpop.f32.mrf.mxu1  ;;  %v232_v59 = vadd.f32 %v6028_v1, %v6013_v46 }
  0xe8   :  { %v6017_v62 = vpop.f32.mrf.mxu0 }
  0xe9   :  { %v6019_v33 = vpop.f32.mrf.mxu1  ;;  %v262_v31 = vadd.f32 %v6017_v62, %v6028_v1 }
  0xea   :  { %v6021_v49 = vpop.f32.mrf.mxu0 }
  0xeb   :  { %v6023_v61 = vpop.f32.mrf.mxu1 }
  0xec   :  { %v4446_v25 = vpop.f32.mrf.mxu0 }
  0xed   :  { %v6030_v21 = vpop.f32.mrf.mxu1  ;;  %v282_v17 = vadd.f32 %v4446_v25, %v6028_v1 }
  0xee   :  { %v6033_v6 = vpop.f32.mrf.mxu0  ;;  %v475_v62 = vadd.f32 %v6030_v21, %v262_v31 }
  0xef   :  { %v6035_v19 = vpop.f32.mrf.mxu1 }
  0xf0   :  { %v4449_v32 = vpop.f32.mrf.mxu0 }
  0xf1   :  { %v4478_v3 = vpop.f32.mrf.mxu1  ;;  %v302_v56 = vadd.f32 %v4449_v32, %v6028_v1 }
  0xf2   :  { %v6038_v0 = vadd.f32 %v4478_v3, %v282_v17  ;;  %v6040_v52 = vpop.f32.mrf.mxu0 }
  0xf3   :  { %v6042_v53 = vpop.f32.mrf.mxu1 }
  0xf4   :  { %v4452_v41 = vpop.f32.mrf.mxu0 }
  0xf5   :  { %v4481_v34 = vpop.f32.mrf.mxu1  ;;  %v322_v8 = vadd.f32 %v4452_v41, %v6028_v1 }
  0xf6   :  { %v6045_v36 = vadd.f32 %v4481_v34, %v302_v56  ;;  %v6047_v25 = vpop.f32.mrf.mxu0 }
  0xf7   :  { %v6049_v27 = vpop.f32.mrf.mxu1 }
  0xf8   :  { %v4455_v22 = vpop.f32.mrf.mxu0 }
  0xf9   :  { %v4484_v63 = vpop.f32.mrf.mxu1  ;;  %v342_v32 = vadd.f32 %v4455_v22, %v6028_v1 }
  0xfa   :  { %v6052_v3 = vadd.f32 %v4484_v63, %v322_v8  ;;  %v6054_v17 = vpop.f32.mrf.mxu0 }
  0xfb   :  { %v6056_v40 = vpop.f32.mrf.mxu1 }
  0xfc   :  { %v4498_v37 = vpop.f32.mrf.mxu0 }
  0xfd   :  { %v4487_v35 = vpop.f32.mrf.mxu1 }
  0xfe   :  { %v6058_v39 = vadd.f32 %v4487_v35, %v342_v32  ;;  %v602_v34 = vpop.f32.mrf.mxu0 }
  0xff   :  { %v6060_v41 = vpop.f32.mrf.mxu1 }
 0x100   :  { %7777 = vst [vmem:[#allocation50_spill] sm:$0xff] %v6058_v39  ;;  %v4501_v56 = vpop.f32.mrf.mxu0 }
 0x101   :  { %v4530_v5 = vpop.f32.mrf.mxu1  ;;  %v624_v9 = vadd.f32 %v4501_v56, %v451_v44 }
 0x102   :  { %v6062_v38 = vpop.f32.mrf.mxu0 }
 0x103   :  { %v784_v50 = vpop.f32.mrf.mxu1 }
 0x104   :  { %v6064_v58 = vpop.f32.mrf.mxu0 }
 0x105   :  { %v4533_v22 = vpop.f32.mrf.mxu1 }
 0x106   :  { %v6066_v8 = vpop.f32.mrf.mxu0 }
 0x107   :  { %v6068_v63 = vpop.f32.mrf.mxu1 }
 0x108   :  { %v6070_v30 = vpop.f32.mrf.mxu0 }
 0x109   :  { %v6072_v16 = vpop.f32.mrf.mxu1 }
 0x10a   :  { %v6074_v35 = vpop.f32.mrf.mxu0 }
 0x10b   :  { %v6076_v32 = vpop.f32.mrf.mxu1 }
 0x10c   :  { %v6078_v55 = vpop.f32.mrf.mxu0 }
 0x10d   :  { %v6080_v18 = vpop.f32.mrf.mxu1 }
 0x10e   :  { %v6082_v54 = vpop.f32.mrf.mxu0 }
 0x10f   :  { %v6084_v2 = vpop.f32.mrf.mxu1 }
 0x110   :  { %v6086_v42 = vpop.f32.mrf.mxu0 }
 0x111   :  { %v6088_v57 = vpop.f32.mrf.mxu1 }
 0x112   :  { %v6090_v20 = vpop.f32.mrf.mxu0 }
 0x113   :  { %v6092_v60 = vpop.f32.mrf.mxu1 }
 0x114   :  { %v6094_v11 = vpop.f32.mrf.mxu0 }
 0x115   :  { %v6096_v43 = vpop.f32.mrf.mxu1 }
 0x116   :  { %7778 = vst [vmem:[#allocation51_spill] sm:$0xff] %v6096_v43  ;;  %v6100_v39 = vpop.f32.mrf.mxu0 }
 0x117   :  { %7779 = vst [vmem:[#allocation52_spill] sm:$0xff] %v6100_v39  ;;  %v6102_v14 = vpop.f32.mrf.mxu1 }
 0x118   :  { %7780 = vst [vmem:[#allocation53_spill] sm:$0xff] %v6102_v14  ;;  %v6104_v28 = vpop.f32.mrf.mxu0  ;;  %v610_v14 = vadd.f32 %v4498_v37, %v439_v48  ;;  %v272_v48 = vadd.f32 %v6028_v1, %v6033_v6 }
 0x119   :  { %7781 = vst [vmem:[#allocation54_spill] sm:$0xff] %v6104_v28  ;;  %v6106_v10 = vpop.f32.mrf.mxu1  ;;  %v212_v28 = vadd.f32 %v6028_v1, %v6005_v12  ;;  %v252_v12 = vadd.f32 %v6028_v1, %v6021_v49  ;;  %v809_v49 = vadd.f32 %v4533_v22, %v624_v9  ;;  %v652_v22 = vadd.f32 %v6070_v30, %v475_v62 }
 0x11a   :  { %7782 = vst [vmem:[#allocation55_spill] sm:$0xff] %v6106_v10  ;;  %v6115_v26 = vpop.f32.mrf.mxu0  ;;  %v433_v10 = vadd.f32 %v6007_v13, %v192_v23  ;;  %v793_v43 = vadd.f32 %v4530_v5, %v610_v14  ;;  %v463_v23 = vadd.f32 %v6019_v33, %v242_v29  ;;  %v457_v13 = vadd.f32 %v6023_v61, %v232_v59 }
 0x11b   :  { %7783 = vst [vmem:[#allocation56_spill] sm:$0xff] %v6115_v26  ;;  %v6117_v39 = vpop.f32.mrf.mxu1  ;;  %v445_v26 = vadd.f32 %v6015_v51, %v212_v28  ;;  %v292_v14 = vadd.f32 %v6028_v1, %v6040_v52  ;;  %v481_v29 = vadd.f32 %v6042_v53, %v272_v48  ;;  %v312_v5 = vadd.f32 %v6028_v1, %v6047_v25 }
 0x11c   :  { %7784 = vst [vmem:[#allocation57_spill] sm:$0xff] %v6117_v39  ;;  %v4562_v47 = vpop.f32.mrf.mxu0  ;;  %v603_v39 = vadd.f32 %v602_v34, %v433_v10  ;;  %v469_v10 = vadd.f32 %v6035_v19, %v252_v12  ;;  %v332_v33 = vadd.f32 %v6028_v1, %v6054_v17  ;;  %v638_v53 = vadd.f32 %v6064_v58, %v463_v23 }
 0x11d   :  { %v6126_v7 = vpop.f32.mrf.mxu1  ;;  %v994_v28 = vadd.f32 %v4562_v47, %v793_v43  ;;  %v493_v43 = vadd.f32 %v6049_v27, %v292_v14  ;;  %v617_v52 = vadd.f32 %v6062_v38, %v445_v26  ;;  %v631_v17 = vadd.f32 %v6066_v8, %v457_v13 }
 0x11e   :  { %v987_v37 = vpop.f32.mrf.mxu0  ;;  %v785_v45 = vadd.f32 %v784_v50, %v603_v39  ;;  %v6149_v50 = vadd.f32 %v6056_v40, %v312_v5  ;;  %v6154_v25 = vadd.f32 %v6060_v41, %v332_v33  ;;  %v825_v40 = vadd.f32 %v6072_v16, %v638_v53 }
 0x11f   :  { %v6136_v46 = vpop.f32.mrf.mxu1  ;;  %v801_v27 = vadd.f32 %v6068_v63, %v617_v52  ;;  %v645_v58 = vadd.f32 %v6074_v35, %v469_v10  ;;  %v666_v47 = vadd.f32 %v6078_v55, %v6038_v0  ;;  %v817_v44 = vadd.f32 %v6076_v32, %v631_v17 }
 0x120   :  { %v4565_v51 = vpop.f32.mrf.mxu0  ;;  %v988_v21 = vadd.f32 %v987_v37, %v785_v45  ;;  %v841_v8 = vadd.f32 %v6080_v18, %v652_v22  ;;  %v659_v16 = vadd.f32 %v6082_v54, %v481_v29  ;;  %v680_v48 = vadd.f32 %v6086_v42, %v6045_v36 }
 0x121   :  { %v4594_v6 = vpop.f32.mrf.mxu1  ;;  %v1006_v34 = vadd.f32 %v4565_v51, %v809_v49  ;;  %v833_v55 = vadd.f32 %v6084_v2, %v645_v58  ;;  %v857_v36 = vadd.f32 %v6088_v57, %v666_v47 }
 0x122   :  { %v1159_v61 = vadd.f32 %v4594_v6, %v994_v28  ;;  %v999_v19 = vpop.f32.mrf.mxu0  ;;  %v673_v28 = vadd.f32 %v6090_v20, %v493_v43  ;;  %v849_v29 = vadd.f32 %v6092_v60, %v659_v16  ;;  %v6193_v20 = vadd.f32 %v6094_v11, %v6052_v3 }
 0x123   :  { %v1152_v39 = vpop.f32.mrf.mxu1  ;;  %v1000_v30 = vadd.f32 %v999_v19, %v801_v27 }
 0x124   :  { %v1247_v56 = vmax.f32 %v1159_v61, 0.0  ;;  %v1153_v1 = vadd.f32 %v1152_v39, %v988_v21  ;;  %v4568_v31 = vpop.f32.mrf.mxu0 }
 0x125   :  { %v4597_v38 = vpop.f32.mrf.mxu1  ;;  %v1018_v0 = vadd.f32 %v4568_v31, %v825_v40 }
 0x126   :  { %v6161_v26 = vand.u32 4294901760, %v1247_v56  ;;  %v1246_v59 = vmax.f32 %v1153_v1, 0.0  ;;  %v1171_v41 = vadd.f32 %v4597_v38, %v1006_v34  ;;  %v1011_v12 = vpop.f32.mrf.mxu0  ;;  %v7785_v1 = vld [vmem:[#allocation51_spill] sm:$0xff] }
 0x127   :  { %v1164_v63 = vpop.f32.mrf.mxu1  ;;  %v1012_v54 = vadd.f32 %v1011_v12, %v817_v44  ;;  %v873_v17 = vadd.f32 %v7785_v1, %v680_v48  ;;  %v7792_v1 = vld [vmem:[#allocation15_spill] sm:$0xff] }
 0x128   :  { %v6169_v23 = vsub.f32 %v1247_v56, %v6161_v26  ;;  %v6171_v35 = vand.u32 4294901760, %v1246_v59  ;;  %v1249_v13 = vmax.f32 %v1171_v41, 0.0  ;;  %v4571_v32 = vpop.f32.mrf.mxu0  ;;  %v1165_v37 = vadd.f32 %v1164_v63, %v1000_v30  ;;  %v7786_v63 = vld [vmem:[#allocation10_spill] sm:$0xff] }
 0x129   :  { %v4600_v18 = vpop.f32.mrf.mxu1  ;;  %v1030_v51 = vadd.f32 %v4571_v32, %v841_v8 }
 0x12a   :  { %v1378_v62 = vand.u32 4294901760, %v6169_v23  ;;  %v6178_v9 = vsub.f32 %v1246_v59, %v6171_v35  ;;  %v6180_v45 = vand.u32 4294901760, %v1249_v13  ;;  %4704 = vmatprep.mubr.f32.mxu1 %v6171_v35  ;;  %v1248_v42 = vmax.f32 %v1165_v37, 0.0  ;;  %v1023_v2 = vpop.f32.mrf.mxu0  ;;  %v7787_v37 = vld [vmem:[#allocation53_spill] sm:$0xff] }
 0x12b   :  { %v1183_v10 = vadd.f32 %v4600_v18, %v1018_v0  ;;  %v1176_v14 = vpop.f32.mrf.mxu1  ;;  %4705 = vmatmul.mubr.f32.vlgmr.msra.gmra.mxu1 %v6161_v26  ;;  %v1024_v43 = vadd.f32 %v1023_v2, %v833_v55  ;;  %v865_v18 = vadd.f32 %v7787_v37, %v673_v28 }
 0x12c   :  { %v6188_v5 = vsub.f32 %v1249_v13, %v6180_v45  ;;  %v1177_v6 = vadd.f32 %v1176_v14, %v1012_v54  ;;  %4785 = vmatpush3.msra.mxu1 %v5758_v4  ;;  %v6195_v57 = vand.u32 4294901760, %v1248_v42  ;;  %v4574_v49 = vpop.f32.mrf.mxu0  ;;  %v1368_v60 = vand.u32 4294901760, %v6178_v9  ;;  %v7788_v14 = vld [vmem:[#allocation13_spill] sm:$0xff] }
 0x12d   :  { %v1251_v33 = vmax.f32 %v1183_v10, 0.0  ;;  %v4603_v21 = vpop.f32.mrf.mxu1  ;;  %4786 = vmatprep.subr.mxu1 %v5766_v15  ;;  %v1379_v61 = vsub.f32 %v6169_v23, %v1378_v62  ;;  %v1042_v38 = vadd.f32 %v4574_v49, %v857_v36  ;;  %v7790_v49 = vld [vmem:[#allocation52_spill] sm:$0xff] }
 0x12e   :  { %v1250_v52 = vmax.f32 %v1177_v6, 0.0  ;;  %v1195_v53 = vadd.f32 %v4603_v21, %v1030_v51  ;;  %4787 = vmatpush3.msra.mxu1 %v5766_v15  ;;  %v6204_v11 = vsub.f32 %v1248_v42, %v6195_v57  ;;  %v1035_v19 = vpop.f32.mrf.mxu0  ;;  %4707 = vmatprep.mubr.f32.mxu1 %v6195_v57  ;;  %v1369_v34 = vsub.f32 %v6178_v9, %v1368_v60 }
 0x12f   :  { %v6206_v3 = vand.u32 4294901760, %v1251_v33  ;;  %v1188_v39 = vpop.f32.mrf.mxu1  ;;  %4788 = vmatprep.subr.mxu1 %v5779_v24  ;;  %v1398_v56 = vand.u32 4294901760, %v6188_v5  ;;  %4708 = vmatmul.mubr.f32.gmra.mxu1 %v6180_v45  ;;  %v1380_v44 = vand.u32 4294901760, %v1379_v61  ;;  %v1036_v30 = vadd.f32 %v1035_v19, %v849_v29  ;;  %v7789_v29 = vld [vmem:[#allocation5_spill] sm:$0xff] }
 0x130   :  { %v6215_v22 = vand.u32 4294901760, %v1250_v52  ;;  %v1253_v27 = vmax.f32 %v1195_v53, 0.0  ;;  %v1189_v40 = vadd.f32 %v1188_v39, %v1024_v43  ;;  %v4577_v58 = vpop.f32.mrf.mxu0  ;;  %4789 = vmatpush3.msra.mxu1 %v5779_v24  ;;  %v1370_v41 = vand.u32 4294901760, %v1369_v34  ;;  %v7791_v53 = vld [vmem:[#allocation7_spill] sm:$0xff] }
 0x131   :  { %v6219_v31 = vsub.f32 %v1251_v33, %v6206_v3  ;;  %v4606_v59 = vpop.f32.mrf.mxu1  ;;  %v1388_v47 = vand.u32 4294901760, %v6204_v11  ;;  %4790 = vmatprep.subr.mxu1 %v7786_v63  ;;  %v1399_v32 = vsub.f32 %v6188_v5, %v1398_v56  ;;  %v1054_v54 = vadd.f32 %v4577_v58, %v873_v17 }
 0x132   :  { %v6224_v8 = vsub.f32 %v1250_v52, %v6215_v22  ;;  %v1252_v12 = vmax.f32 %v1189_v40, 0.0  ;;  %4710 = vmatprep.mubr.f32.mxu1 %v6215_v22  ;;  %v6228_v16 = vand.u32 4294901760, %v1253_v27  ;;  %v1047_v13 = vpop.f32.mrf.mxu0  ;;  %v6230_v48 = vadd.f32 %v4606_v59, %v1042_v38  ;;  %4648 = vmatprep.mubr.f32.mxu0 %v1370_v41  ;;  %v7793_v38 = vld [vmem:[#allocation55_spill] sm:$0xff]  ;;  %v7794_v59 = vld [vmem:[#allocation57_spill] sm:$0xff] }
 0x133   :  { %4791 = vmatpush3.msra.mxu1 %v7786_v63  ;;  %v1200_v55 = vpop.f32.mrf.mxu1  ;;  %v1389_v0 = vsub.f32 %v6204_v11, %v1388_v47  ;;  %4649 = vmatmul.mubr.f32.vlgmr.msra.gmra.mxu0 %v1380_v44  ;;  %v1418_v28 = vand.u32 4294901760, %v6219_v31  ;;  %v687_v21 = vadd.f32 %v7790_v49, %v6149_v50  ;;  %v1048_v43 = vadd.f32 %v1047_v13, %v865_v18 }
 0x134   :  { %v6240_v36 = vand.u32 4294901760, %v1252_v12  ;;  %v1201_v42 = vadd.f32 %v1200_v55, %v1036_v30  ;;  %4711 = vmatmul.mubr.f32.gmra.mxu1 %v6206_v3  ;;  %v1255_v2 = vmax.f32 %v6230_v48, 0.0  ;;  %v4580_v10 = vpop.f32.mrf.mxu0  ;;  %4792 = vmatprep.subr.mxu1 %v7788_v14  ;;  %v1408_v33 = vand.u32 4294901760, %v6224_v8 }
 0x135   :  { %4729 = vmatpush3.msra.mxu0 %v7789_v29  ;;  %v4609_v51 = vpop.f32.mrf.mxu1  ;;  %v1390_v6 = vand.u32 4294901760, %v1389_v0  ;;  %4793 = vmatpush3.msra.mxu1 %v7788_v14  ;;  %v6256_v19 = vsub.f32 %v1253_v27, %v6228_v16  ;;  %v1400_v50 = vand.u32 4294901760, %v1399_v32  ;;  %v889_v58 = vadd.f32 %v7793_v38, %v6193_v20  ;;  %v7795_v0 = vld [vmem:[#allocation56_spill] sm:$0xff] }
 0x136   :  { %v6251_v61 = vsub.f32 %v1252_v12, %v6240_v36  ;;  %v1254_v52 = vmax.f32 %v1201_v42, 0.0  ;;  %4730 = vmatprep.subr.mxu0 %v7791_v53  ;;  %v1059_v39 = vpop.f32.mrf.mxu0  ;;  %v6258_v34 = vadd.f32 %v4609_v51, %v1054_v54  ;;  %4794 = vmatprep.subr.mxu1 %v7792_v1  ;;  %v1409_v40 = vsub.f32 %v6224_v8, %v1408_v33  ;;  %v7796_v42 = vld [vmem:[#allocation9_spill] sm:$0xff] }
 0x137   :  { %4651 = vmatprep.mubr.f32.mxu0 %v1390_v6  ;;  %v1212_v17 = vpop.f32.mrf.mxu1  ;;  %v881_v41 = vadd.f32 %v7794_v59, %v687_v21  ;;  %4713 = vmatprep.mubr.f32.mxu1 %v6240_v36  ;;  %v6271_v30 = vand.u32 4294901760, %v1255_v2  ;;  %v1419_v20 = vsub.f32 %v6219_v31, %v1418_v28  ;;  %v701_v32 = vadd.f32 %v7795_v0, %v6154_v25  ;;  %v7797_v6 = vld [vmem:[#allocation18_spill] sm:$0xff] }
 0x138   :  { %v6267_v44 = vand.u32 4294901760, %v1254_v52  ;;  %4731 = vmatpush3.msra.mxu0 %v7791_v53  ;;  %v1213_v27 = vadd.f32 %v1212_v17, %v1048_v43  ;;  %4795 = vmatpush3.msra.mxu1 %v7792_v1  ;;  %v4583_v12 = vpop.f32.mrf.mxu0  ;;  %v1410_v48 = vand.u32 4294901760, %v1409_v40  ;;  %v1428_v55 = vand.u32 4294901760, %v6251_v61  ;;  %v7799_v53 = vld [vmem:[#allocation54_spill] sm:$0xff] }
 0x139   :  { %4652 = vmatmul.mubr.f32.gmra.mxu0 %v1400_v50  ;;  %v4612_v13 = vpop.f32.mrf.mxu1  ;;  %v1060_v18 = vadd.f32 %v1059_v39, %v881_v41  ;;  %4714 = vmatmul.mubr.f32.gmra.mxu1 %v6228_v16  ;;  %v1066_v29 = vadd.f32 %v4580_v10, %v889_v58  ;;  %v1257_v51 = vmax.f32 %v6258_v34, 0.0  ;;  %v1438_v43 = vand.u32 4294901760, %v6256_v19  ;;  %v7800_v34 = vld [vmem:[#allocation12_spill] sm:$0xff]  ;;  %v7801_v58 = vld [vmem:[#allocation22_spill] sm:$0xff] }
 0x13a   :  { %v6281_v37 = vsub.f32 %v1254_v52, %v6267_v44  ;;  %v1256_v54 = vmax.f32 %v1213_v27, 0.0  ;;  %4732 = vmatprep.subr.mxu0 %v7796_v42  ;;  %4796 = vmatprep.subr.mxu1 %v7797_v6  ;;  %v1071_v49 = vpop.f32.mrf.mxu0  ;;  %v1429_v25 = vsub.f32 %v6251_v61, %v1428_v55  ;;  %v7798_v52 = vld [vmem:[#allocation50_spill] sm:$0xff]  ;;  %v897_v17 = vadd.f32 %v6136_v46, %v701_v32 }
 0x13b   :  { %4733 = vmatpush3.msra.mxu0 %v7796_v42  ;;  %v1224_v21 = vpop.f32.mrf.mxu1  ;;  %v708_v39 = vadd.f32 %v7799_v53, %v7798_v52  ;;  %4797 = vmatpush3.msra.mxu1 %v7797_v6  ;;  %v6300_v40 = vsub.f32 %v1255_v2, %v6271_v30  ;;  %v1231_v38 = vadd.f32 %v4612_v13, %v1066_v29  ;;  %v1420_v59 = vand.u32 4294901760, %v1419_v20  ;;  %v7802_v20 = vld [vmem:[#allocation16_spill] sm:$0xff]  ;;  %v7804_v53 = vld [vmem:[#allocation17_spill] sm:$0xff] }
 0x13c   :  { %v6295_v10 = vand.u32 4294901760, %v1256_v54  ;;  %4734 = vmatprep.subr.mxu0 %v7800_v34  ;;  %v1225_v50 = vadd.f32 %v1224_v21, %v1060_v18  ;;  %4798 = vmatprep.subr.mxu1 %v7801_v58  ;;  %v7627_v27 = vand.u32 4294901760, %v6281_v37  ;;  %v1072_v0 = vadd.f32 %v1071_v49, %v897_v17  ;;  %v7803_v21 = vld [vmem:[#allocation25_spill] sm:$0xff]  ;;  %v7805_v17 = vld [vmem:[#allocation28_spill] sm:$0xff] }
 0x13d   :  { %4654 = vmatprep.mubr.f32.mxu0 %v1410_v48  ;;  %v4615_v41 = vpop.f32.mrf.mxu1  ;;  %v905_v46 = vadd.f32 %v6126_v7, %v708_v39  ;;  %4716 = vmatprep.mubr.f32.mxu1 %v6267_v44  ;;  %v6307_v18 = vand.u32 4294901760, %v1257_v51  ;;  %v1430_v13 = vand.u32 4294901760, %v1429_v25  ;;  %v1439_v7 = vsub.f32 %v6256_v19, %v1438_v43 }
 0x13e   :  { %4735 = vmatpush3.msra.mxu0 %v7800_v34  ;;  %v1258_v32 = vmax.f32 %v1225_v50, 0.0  ;;  %v6310_v2 = vsub.f32 %v1256_v54, %v6295_v10  ;;  %4799 = vmatpush3.msra.mxu1 %v7801_v58  ;;  %v1259_v49 = vmax.f32 %v1231_v38, 0.0  ;;  %v1449_v54 = vsub.f32 %v6281_v37, %v7627_v27 }
 0x13f   :  { %4655 = vmatmul.mubr.f32.gmra.mxu0 %v1420_v59  ;;  %v1236_v48 = vpop.f32.mrf.mxu1  ;;  %4717 = vmatmul.mubr.f32.gmra.mxu1 %v6271_v30  ;;  %v1078_v29 = vadd.f32 %v4583_v12, %v905_v46  ;;  %v7625_v25 = vand.u32 4294901760, %v6300_v40  ;;  %v6329_v39 = vsub.f32 %v1257_v51, %v6307_v18  ;;  %v1440_v34 = vand.u32 4294901760, %v1439_v7 }
 0x140   :  { %4736 = vmatprep.subr.mxu0 %v7802_v20  ;;  %v1237_v42 = vadd.f32 %v1236_v48, %v1072_v0  ;;  %4800 = vmatprep.subr.mxu1 %v7803_v21  ;;  %v6324_v52 = vand.u32 4294901760, %v1258_v32  ;;  %v7623_v50 = vand.u32 4294901760, %v6310_v2  ;;  %v6335_v59 = vand.u32 4294901760, %v1259_v49  ;;  %v7806_v0 = vld [vmem:[#allocation21_spill] sm:$0xff]  ;;  %v7807_v48 = vld [vmem:[#allocation30_spill] sm:$0xff] }
 0x141   :  { %4737 = vmatpush3.msra.mxu0 %v7802_v20  ;;  %4801 = vmatpush3.msra.mxu1 %v7803_v21  ;;  %v1243_v12 = vadd.f32 %v4615_v41, %v1078_v29  ;;  %v1450_v46 = vand.u32 4294901760, %v1449_v54  ;;  %v1459_v51 = vsub.f32 %v6300_v40, %v7625_v25  ;;  %v7624_v20 = vand.u32 4294901760, %v6329_v39  ;;  %v7809_v54 = vld [vmem:[#allocation33_spill] sm:$0xff] }
 0x142   :  { %4738 = vmatprep.subr.mxu0 %v7804_v53  ;;  %4802 = vmatprep.subr.mxu1 %v7805_v17  ;;  %v1260_v38 = vmax.f32 %v1237_v42, 0.0  ;;  %v6342_v41 = vsub.f32 %v1258_v32, %v6324_v52  ;;  %v1469_v7 = vsub.f32 %v6310_v2, %v7623_v50  ;;  %v7808_v32 = vld [vmem:[#allocation24_spill] sm:$0xff]  ;;  %v6357_v29 = vsub.f32 %v1259_v49, %v6335_v59 }
 0x143   :  { %4657 = vmatprep.mubr.f32.mxu0 %v1430_v13  ;;  %4719 = vmatprep.mubr.f32.mxu1 %v6295_v10  ;;  %v1261_v13 = vmax.f32 %v1243_v12, 0.0  ;;  %v1479_v49 = vsub.f32 %v6329_v39, %v7624_v20  ;;  %v7813_v20 = vld [vmem:[#allocation40_spill] sm:$0xff] }
 0x144   :  { %4739 = vmatpush3.msra.mxu0 %v7804_v53  ;;  %4803 = vmatpush3.msra.mxu1 %v7805_v17  ;;  %v6352_v42 = vand.u32 4294901760, %v1260_v38  ;;  %v1460_v53 = vand.u32 4294901760, %v1459_v51  ;;  %v7626_v12 = vand.u32 4294901760, %v6342_v41  ;;  %v7811_v51 = vld [vmem:[#allocation37_spill] sm:$0xff] }
 0x145   :  { %4658 = vmatmul.mubr.f32.gmra.mxu0 %v1440_v34  ;;  %4720 = vmatmul.mubr.f32.gmra.mxu1 %v6307_v18  ;;  %v6363_v34 = vand.u32 4294901760, %v1261_v13  ;;  %v1480_v25 = vand.u32 4294901760, %v1479_v49 }
 0x146   :  { %4740 = vmatprep.subr.mxu0 %v7806_v0  ;;  %4804 = vmatprep.subr.mxu1 %v7807_v48  ;;  %v6370_v50 = vsub.f32 %v1260_v38, %v6352_v42 }
 0x147   :  { %4741 = vmatpush3.msra.mxu0 %v7806_v0  ;;  %4805 = vmatpush3.msra.mxu1 %v7807_v48  ;;  %v1470_v0 = vand.u32 4294901760, %v1469_v7  ;;  %v7812_v7 = vld [vmem:[#allocation31_spill] sm:$0xff]  ;;  %v6383_v38 = vsub.f32 %v1261_v13, %v6363_v34  ;;  %v7814_v13 = vld [vmem:[#allocation32_spill] sm:$0xff] }
 0x148   :  { %4742 = vmatprep.subr.mxu0 %v7808_v32  ;;  %4806 = vmatprep.subr.mxu1 %v7809_v54 }
 0x149   :  { %4660 = vmatprep.mubr.f32.mxu0 %v1450_v46  ;;  %4722 = vmatprep.mubr.f32.mxu1 %v6324_v52  ;;  %v7810_v46 = vld [vmem:[#allocation27_spill] sm:$0xff]  ;;  %v1518_v49 = vand.u32 4294901760, %v6383_v38 }
 0x14a   :  { %4743 = vmatpush3.msra.mxu0 %v7808_v32  ;;  %4807 = vmatpush3.msra.mxu1 %v7809_v54  ;;  %v7628_v32 = vand.u32 4294901760, %v6357_v29 }
 0x14b   :  { %4661 = vmatmul.mubr.f32.gmra.mxu0 %v1460_v53  ;;  %4723 = vmatmul.mubr.f32.gmra.mxu1 %v6335_v59  ;;  %v1489_v53 = vsub.f32 %v6342_v41, %v7626_v12 }
 0x14c   :  { %4744 = vmatprep.subr.mxu0 %v7810_v46  ;;  %4808 = vmatprep.subr.mxu1 %v7811_v51  ;;  %v1499_v12 = vsub.f32 %v6357_v29, %v7628_v32  ;;  %v7817_v32 = vld [vmem:[#allocation45_spill] sm:$0xff] }
 0x14d   :  { %4745 = vmatpush3.msra.mxu0 %v7810_v46  ;;  %4809 = vmatpush3.msra.mxu1 %v7811_v51  ;;  %v7629_v46 = vand.u32 4294901760, %v6370_v50  ;;  %v1490_v27 = vand.u32 4294901760, %v1489_v53 }
 0x14e   :  { %4746 = vmatprep.subr.mxu0 %v7812_v7  ;;  %4810 = vmatprep.subr.mxu1 %v7813_v20  ;;  %v1500_v53 = vand.u32 4294901760, %v1499_v12 }
 0x14f   :  { %4663 = vmatprep.mubr.f32.mxu0 %v1470_v0  ;;  %4725 = vmatprep.mubr.f32.mxu1 %v6352_v42  ;;  %v7815_v0 = vld [vmem:[#allocation43_spill] sm:$0xff] }
 0x150   :  { %4747 = vmatpush3.msra.mxu0 %v7812_v7  ;;  %4811 = vmatpush3.msra.mxu1 %v7813_v20  ;;  %v7816_v7 = vld [vmem:[#allocation36_spill] sm:$0xff] }
 0x151   :  { %4664 = vmatmul.mubr.f32.gmra.mxu0 %v1480_v25  ;;  %4726 = vmatmul.mubr.f32.gmra.mxu1 %v6363_v34  ;;  %v1509_v25 = vsub.f32 %v6370_v50, %v7629_v46 }
 0x152   :  { %4748 = vmatprep.subr.mxu0 %v7814_v13  ;;  %4812 = vmatprep.subr.mxu1 %v7815_v0 }
 0x153   :  { %4749 = vmatpush3.msra.mxu0 %v7814_v13  ;;  %4813 = vmatpush3.msra.mxu1 %v7815_v0  ;;  %v1519_v13 = vsub.f32 %v6383_v38, %v1518_v49  ;;  %v1510_v46 = vand.u32 4294901760, %v1509_v25  ;;  %v2595_v25 = vld [vmem:[#allocation2 + $0x40] sm:$0xff] }
 0x154   :  { %4816 = vmatprep.mubr.f32.mxu1 %v1368_v60  ;;  %4750 = vmatprep.subr.mxu0 %v7816_v7  ;;  %v7818_v60 = vld [vmem:[#allocation39_spill] sm:$0xff] }
 0x155   :  { %4814 = vmatprep.subr.mxu1 %v7817_v32  ;;  %4666 = vmatprep.mubr.f32.mxu0 %v1490_v27  ;;  %v7819_v27 = vld [vmem:[#allocation42_spill] sm:$0xff]  ;;  %v1520_v12 = vand.u32 4294901760, %v1519_v13 }
 0x156   :  { %4751 = vmatpush3.msra.mxu0 %v7816_v7  ;;  %4815 = vmatpush3.msra.mxu1 %v7817_v32 }
 0x157   :  { %4667 = vmatmul.mubr.f32.gmra.mxu0 %v1500_v53  ;;  %4752 = vmatprep.subr.mxu0 %v7818_v60 }
 0x158   :  { %4817 = vmatmul.mubr.f32.vlgmr.msra.gmra.mxu1 %v1378_v62  ;;  %4896 = vmatprep.subr.mxu1 %v5758_v4  ;;  %v7820_v62 = vld [vmem:[#allocation46_spill] sm:$0xff] }
 0x159   :  { %4753 = vmatpush3.msra.mxu0 %v7818_v60  ;;  %4819 = vmatprep.mubr.f32.mxu1 %v1388_v47  ;;  %v7829_v47 = vand.u32 4294901760, %v6310_v2  ;;  %v6633_v60 = vand.u32 4294901760, %v2595_v25 }
 0x15a   :  { %4897 = vmatpush3.msra.mxu1 %v5758_v4  ;;  %4754 = vmatprep.subr.mxu0 %v7819_v27  ;;  %v7821_v4 = vld [vmem:[#allocation47_spill] sm:$0xff] }
 0x15b   :  { %4898 = vmatprep.subr.mxu1 %v5766_v15  ;;  %4669 = vmatprep.mubr.f32.mxu0 %v1510_v46  ;;  %7865 = vst [vmem:[#allocation28_spill] sm:$0xff] %v6633_v60 }
 0x15c   :  { %4755 = vmatpush3.msra.mxu0 %v7819_v27  ;;  %4899 = vmatpush3.msra.mxu1 %v5766_v15  ;;  %v7822_v15 = vld [vmem:[#allocation6_spill] sm:$0xff] }
 0x15d   :  { %4670 = vmatmul.mubr.f32.gmra.mxu0 %v1520_v12  ;;  %4756 = vmatprep.subr.mxu0 %v7820_v62  ;;  %v2594_v12 = vld [vmem:[#allocation2 + $0x38] sm:$0xff] }
 0x15e   :  { %4820 = vmatmul.mubr.f32.gmra.mxu1 %v1398_v56  ;;  %4900 = vmatprep.subr.mxu1 %v5779_v24  ;;  %v7828_v56 = vld [vmem:[#allocation19_spill] sm:$0xff] }
 0x15f   :  { %4757 = vmatpush3.msra.mxu0 %v7820_v62  ;;  %4760 = vmatprep.mubr.f32.mxu0 %v6178_v9  ;;  %v7825_v9 = vand.u32 4294901760, %v6281_v37 }
 0x160   :  { %4822 = vmatprep.mubr.f32.mxu1 %v1408_v33  ;;  %4901 = vmatpush3.msra.mxu1 %v5779_v24  ;;  %v7823_v24 = vld [vmem:[#allocation8_spill] sm:$0xff]  ;;  %v7834_v33 = vld [vmem:[#allocation26_spill] sm:$0xff] }
 0x161   :  { %4758 = vmatprep.subr.mxu0 %v7821_v4  ;;  %4902 = vmatprep.subr.mxu1 %v7786_v63 }
 0x162   :  { %4759 = vmatpush3.msra.mxu0 %v7821_v4  ;;  %4903 = vmatpush3.msra.mxu1 %v7786_v63  ;;  %v7832_v63 = vld [vmem:[#allocation23_spill] sm:$0xff] }
 0x163   :  { %4761 = vmatmul.mubr.f32.vlgmr.msra.gmra.mxu0 %v6169_v23  ;;  %4823 = vmatmul.mubr.f32.gmra.mxu1 %v1418_v28  ;;  %v7824_v23 = vld [vmem:[#allocation11_spill] sm:$0xff]  ;;  %v7835_v28 = vand.u32 4294901760, %v6357_v29 }
 0x164   :  { %4840 = vmatprep.subr.mxu0 %v7822_v15  ;;  %4904 = vmatprep.subr.mxu1 %v7788_v14 }
 0x165   :  { %4763 = vmatprep.mubr.f32.mxu0 %v6204_v11  ;;  %4825 = vmatprep.mubr.f32.mxu1 %v1428_v55  ;;  %v7826_v11 = vld [vmem:[#allocation14_spill] sm:$0xff]  ;;  %v7839_v55 = vld [vmem:[#allocation35_spill] sm:$0xff] }
 0x166   :  { %4841 = vmatpush3.msra.mxu0 %v7822_v15  ;;  %4905 = vmatpush3.msra.mxu1 %v7788_v14  ;;  %v7833_v14 = vand.u32 4294901760, %v6342_v41  ;;  %v6645_v15 = vsub.f32 %v2595_v25, %v6633_v60  ;;  %v2588_v25 = vld [vmem:[#allocation2 + $0x8] sm:$0xff] }
 0x167   :  { %4842 = vmatprep.subr.mxu0 %v7823_v24  ;;  %4906 = vmatprep.subr.mxu1 %v7792_v1 }
 0x168   :  { %4843 = vmatpush3.msra.mxu0 %v7823_v24  ;;  %4907 = vmatpush3.msra.mxu1 %v7792_v1  ;;  %v7838_v1 = vld [vmem:[#allocation34_spill] sm:$0xff]  ;;  %7867 = vst [vmem:[#allocation30_spill] sm:$0xff] %v6645_v15  ;;  %v6647_v24 = vand.u32 4294901760, %v2594_v12 }
 0x169   :  { %4764 = vmatmul.mubr.f32.gmra.mxu0 %v6188_v5  ;;  %4826 = vmatmul.mubr.f32.gmra.mxu1 %v1438_v43  ;;  %v7827_v5 = vand.u32 4294901760, %v6300_v40  ;;  %v7842_v43 = vld [vmem:[#allocation44_spill] sm:$0xff] }
 0x16a   :  { %4844 = vmatprep.subr.mxu0 %v7824_v23  ;;  %4908 = vmatprep.subr.mxu1 %v7797_v6  ;;  %7868 = vst [vmem:[#allocation24_spill] sm:$0xff] %v6647_v24 }
 0x16b   :  { %4766 = vmatprep.mubr.f32.mxu0 %v6224_v8  ;;  %4828 = vmatprep.mubr.f32.mxu1 %v7825_v9  ;;  %v7830_v8 = vld [vmem:[#allocation20_spill] sm:$0xff]  ;;  %v2593_v9 = vld [vmem:[#allocation2 + $0x30] sm:$0xff] }
 0x16c   :  { %4845 = vmatpush3.msra.mxu0 %v7824_v23  ;;  %4909 = vmatpush3.msra.mxu1 %v7797_v6  ;;  %v7841_v6 = vld [vmem:[#allocation41_spill] sm:$0xff] }
 0x16d   :  { %4846 = vmatprep.subr.mxu0 %v7826_v11  ;;  %4910 = vmatprep.subr.mxu1 %v7801_v58 }
 0x16e   :  { %4847 = vmatpush3.msra.mxu0 %v7826_v11  ;;  %4911 = vmatpush3.msra.mxu1 %v7801_v58  ;;  %v7844_v58 = vld [vmem:[#allocation49_spill] sm:$0xff] }
 0x16f   :  { %4767 = vmatmul.mubr.f32.gmra.mxu0 %v6219_v31  ;;  %4829 = vmatmul.mubr.f32.gmra.mxu1 %v7827_v5  ;;  %v7831_v31 = vand.u32 4294901760, %v6329_v39 }
 0x170   :  { %4848 = vmatprep.subr.mxu0 %v7828_v56  ;;  %4912 = vmatprep.subr.mxu1 %v7803_v21 }
 0x171   :  { %4769 = vmatprep.mubr.f32.mxu0 %v6251_v61  ;;  %4831 = vmatprep.mubr.f32.mxu1 %v7829_v47  ;;  %v7836_v61 = vld [vmem:[#allocation29_spill] sm:$0xff]  ;;  %v6657_v47 = vsub.f32 %v2594_v12, %v6647_v24 }
 0x172   :  { %4849 = vmatpush3.msra.mxu0 %v7828_v56  ;;  %4913 = vmatpush3.msra.mxu1 %v7803_v21  ;;  %v6654_v56 = vand.u32 4294901760, %v6645_v15 }
 0x173   :  { %4850 = vmatprep.subr.mxu0 %v7830_v8  ;;  %4914 = vmatprep.subr.mxu1 %v7805_v17  ;;  %7870 = vst [vmem:[#allocation27_spill] sm:$0xff] %v6657_v47 }
 0x174   :  { %4851 = vmatpush3.msra.mxu0 %v7830_v8  ;;  %4915 = vmatpush3.msra.mxu1 %v7805_v17  ;;  %7869 = vst [vmem:[#allocation33_spill] sm:$0xff] %v6654_v56  ;;  %v6660_v8 = vand.u32 4294901760, %v2593_v9 }
 0x175   :  { %4770 = vmatmul.mubr.f32.gmra.mxu0 %v6256_v19  ;;  %4832 = vmatmul.mubr.f32.gmra.mxu1 %v7831_v31  ;;  %v7837_v19 = vand.u32 4294901760, %v6370_v50  ;;  %v2592_v31 = vld [vmem:[#allocation2 + $0x28] sm:$0xff] }
 0x176   :  { %4852 = vmatprep.subr.mxu0 %v7832_v63  ;;  %4916 = vmatprep.subr.mxu1 %v7807_v48  ;;  %7871 = vst [vmem:[#allocation37_spill] sm:$0xff] %v6660_v8 }
 0x177   :  { %4772 = vmatprep.mubr.f32.mxu0 %v6281_v37  ;;  %4834 = vmatprep.mubr.f32.mxu1 %v7833_v14  ;;  %v7840_v37 = vld [vmem:[#allocation38_spill] sm:$0xff]  ;;  %v2904_v14 = vsub.f32 %v6645_v15, %v6654_v56 }
 0x178   :  { %4853 = vmatpush3.msra.mxu0 %v7832_v63  ;;  %4917 = vmatpush3.msra.mxu1 %v7807_v48  ;;  %v2597_v48 = vld [vmem:[#allocation2 + $0x50] sm:$0xff] }
 0x179   :  { %4854 = vmatprep.subr.mxu0 %v7834_v33  ;;  %4918 = vmatprep.subr.mxu1 %v7809_v54 }
 0x17a   :  { %4855 = vmatpush3.msra.mxu0 %v7834_v33  ;;  %4919 = vmatpush3.msra.mxu1 %v7809_v54  ;;  %v6609_v54 = vand.u32 4294901760, %v2597_v48  ;;  %v6666_v33 = vand.u32 4294901760, %v6657_v47 }
 0x17b   :  { %4773 = vmatmul.mubr.f32.gmra.mxu0 %v6300_v40  ;;  %4835 = vmatmul.mubr.f32.gmra.mxu1 %v7835_v28  ;;  %v7843_v40 = vld [vmem:[#allocation48_spill] sm:$0xff]  ;;  %v6668_v28 = vand.u32 4294901760, %v2592_v31 }
 0x17c   :  { %4856 = vmatprep.subr.mxu0 %v7836_v61  ;;  %4920 = vmatprep.subr.mxu1 %v7811_v51  ;;  %7858 = vst [vmem:[#allocation50_spill] sm:$0xff] %v6609_v54  ;;  %v6618_v46 = vsub.f32 %v2597_v48, %v6609_v54  ;;  %7872 = vst [vmem:[#allocation31_spill] sm:$0xff] %v6666_v33 }
 0x17d   :  { %4775 = vmatprep.mubr.f32.mxu0 %v6310_v2  ;;  %4837 = vmatprep.mubr.f32.mxu1 %v7837_v19  ;;  %7873 = vst [vmem:[#allocation40_spill] sm:$0xff] %v6668_v28  ;;  %v2591_v19 = vld [vmem:[#allocation2 + $0x20] sm:$0xff] }
 0x17e   :  { %4857 = vmatpush3.msra.mxu0 %v7836_v61  ;;  %4921 = vmatpush3.msra.mxu1 %v7811_v51  ;;  %v2596_v51 = vld [vmem:[#allocation2 + $0x48] sm:$0xff]  ;;  %7860 = vst [vmem:[#allocation12_spill] sm:$0xff] %v6618_v46  ;;  %v6628_v53 = vand.u32 4294901760, %v6618_v46  ;;  %v6672_v61 = vsub.f32 %v2593_v9, %v6660_v8 }
 0x17f   :  { %4858 = vmatprep.subr.mxu0 %v7838_v1  ;;  %4922 = vmatprep.subr.mxu1 %v7813_v20 }
 0x180   :  { %4859 = vmatpush3.msra.mxu0 %v7838_v1  ;;  %4923 = vmatpush3.msra.mxu1 %v7813_v20  ;;  %7863 = vst [vmem:[#allocation25_spill] sm:$0xff] %v6628_v53  ;;  %v2890_v62 = vsub.f32 %v6618_v46, %v6628_v53  ;;  %7874 = vst [vmem:[#allocation32_spill] sm:$0xff] %v6672_v61  ;;  %v2905_v1 = vand.u32 4294901760, %v2904_v14 }
 0x181   :  { %4776 = vmatmul.mubr.f32.gmra.mxu0 %v6329_v39  ;;  %4838 = vmatmul.mubr.f32.gmra.mxu1 %v1518_v49 }
 0x182   :  { %4860 = vmatprep.subr.mxu0 %v7839_v55  ;;  %4924 = vmatprep.subr.mxu1 %v7815_v0  ;;  %v2891_v11 = vand.u32 4294901760, %v2890_v62 }
 0x183   :  { %4778 = vmatprep.mubr.f32.mxu0 %v6342_v41  ;;  %4861 = vmatpush3.msra.mxu0 %v7839_v55  ;;  %v2911_v55 = vsub.f32 %v6657_v47, %v6666_v33 }
 0x184   :  { %4925 = vmatpush3.msra.mxu1 %v7815_v0  ;;  %4928 = vmatprep.mubr.f32.mxu1 %v6171_v35  ;;  %v6620_v0 = vand.u32 4294901760, %v2596_v51 }
 0x185   :  { %4862 = vmatprep.subr.mxu0 %v7840_v37  ;;  %4926 = vmatprep.subr.mxu1 %v7817_v32 }
 0x186   :  { %4863 = vmatpush3.msra.mxu0 %v7840_v37  ;;  %4927 = vmatpush3.msra.mxu1 %v7817_v32  ;;  %7861 = vst [vmem:[#allocation22_spill] sm:$0xff] %v6620_v0  ;;  %v6631_v13 = vsub.f32 %v2596_v51, %v6620_v0  ;;  %v6678_v37 = vsub.f32 %v2592_v31, %v6668_v28 }
 0x187   :  { %4779 = vmatmul.mubr.f32.gmra.mxu0 %v6357_v29  ;;  %4864 = vmatprep.subr.mxu0 %v7841_v6 }
 0x188   :  { %4929 = vmatmul.mubr.f32.vlgmr.msra.gmra.mxu1 %v6161_v26  ;;  %4781 = vmatprep.mubr.f32.mxu0 %v6370_v50  ;;  %7864 = vst [vmem:[#allocation17_spill] sm:$0xff] %v6631_v13  ;;  %v6642_v4 = vand.u32 4294901760, %v6631_v13  ;;  %7875 = vst [vmem:[#allocation43_spill] sm:$0xff] %v6678_v37 }
 0x189   :  { %4865 = vmatpush3.msra.mxu0 %v7841_v6  ;;  %4931 = vmatprep.mubr.f32.mxu1 %v6195_v57  ;;  %v6680_v6 = vand.u32 4294901760, %v2591_v19 }
 0x18a   :  { %4866 = vmatprep.subr.mxu0 %v7842_v43  ;;  %7866 = vst [vmem:[#allocation21_spill] sm:$0xff] %v6642_v4  ;;  %v2897_v5 = vsub.f32 %v6631_v13, %v6642_v4 }
 0x18b   :  { %4867 = vmatpush3.msra.mxu0 %v7842_v43  ;;  %7876 = vst [vmem:[#allocation36_spill] sm:$0xff] %v6680_v6  ;;  %v6684_v43 = vand.u32 4294901760, %v6672_v61 }
 0x18c   :  { %4782 = vmatmul.mubr.f32.gmra.mxu0 %v6383_v38  ;;  %4868 = vmatprep.subr.mxu0 %v7843_v40  ;;  %v2898_v63 = vand.u32 4294901760, %v2897_v5 }
 0x18d   :  { %4932 = vmatmul.mubr.f32.gmra.mxu1 %v6180_v45  ;;  %4869 = vmatpush3.msra.mxu0 %v7843_v40  ;;  %7877 = vst [vmem:[#allocation45_spill] sm:$0xff] %v6684_v43  ;;  %v2590_v40 = vld [vmem:[#allocation2 + $0x18] sm:$0xff] }
 0x18e   :  { %4872 = vmatprep.mubr.f32.mxu0 %v6171_v35  ;;  %4934 = vmatprep.mubr.f32.mxu1 %v6215_v22 }
 0x18f   :  { %4870 = vmatprep.subr.mxu0 %v7844_v58 }
 0x190   :  { %4871 = vmatpush3.msra.mxu0 %v7844_v58  ;;  %v2912_v58 = vand.u32 4294901760, %v2911_v55 }
 0x191   :  { %4873 = vmatmul.mubr.f32.vlgmr.msra.gmra.mxu0 %v6161_v26  ;;  %4935 = vmatmul.mubr.f32.gmra.mxu1 %v6206_v3  ;;  %v2602_v26 = vld [vmem:[#allocation2 + $0x78] sm:$0xff] }
 0x192   :  { %4875 = vmatprep.mubr.f32.mxu0 %v6195_v57  ;;  %4937 = vmatprep.mubr.f32.mxu1 %v6240_v36  ;;  %v6561_v35 = vand.u32 4294901760, %v2602_v26 }
 0x194   :  { %7845 = vst [vmem:[#allocation51_spill] sm:$0xff] %v6561_v35  ;;  %v6564_v57 = vsub.f32 %v2602_v26, %v6561_v35  ;;  %4952 = vmatprep.subr.mxu0 %v6561_v35  ;;  %v6688_v26 = vand.u32 4294901760, %v6678_v37 }
 0x195   :  { %4876 = vmatmul.mubr.f32.gmra.mxu0 %v6180_v45  ;;  %4938 = vmatmul.mubr.f32.gmra.mxu1 %v6228_v16  ;;  %v2601_v45 = vld [vmem:[#allocation2 + $0x70] sm:$0xff] }
 0x196   :  { %4878 = vmatprep.mubr.f32.mxu0 %v6215_v22  ;;  %4940 = vmatprep.mubr.f32.mxu1 %v6267_v44  ;;  %7846 = vst [vmem:[#allocation10_spill] sm:$0xff] %v6564_v57  ;;  %v2600_v22 = vld [vmem:[#allocation2 + $0x68] sm:$0xff]  ;;  %7878 = vst [vmem:[#allocation39_spill] sm:$0xff] %v6688_v26 }
 0x197   :  { %4953 = vmatpush3.msra.mxu0 %v6561_v35 }
 0x199   :  { %4879 = vmatmul.mubr.f32.gmra.mxu0 %v6206_v3  ;;  %4941 = vmatmul.mubr.f32.gmra.mxu1 %v6271_v30  ;;  %v6566_v3 = vand.u32 4294901760, %v2601_v45 }
 0x19a   :  { %4881 = vmatprep.mubr.f32.mxu0 %v6240_v36  ;;  %4943 = vmatprep.mubr.f32.mxu1 %v6295_v10 }
 0x19b   :  { %7847 = vst [vmem:[#allocation53_spill] sm:$0xff] %v6566_v3  ;;  %v6574_v36 = vsub.f32 %v2601_v45, %v6566_v3  ;;  %4954 = vmatprep.subr.mxu0 %v6566_v3  ;;  %v6691_v45 = vsub.f32 %v2591_v19, %v6680_v6 }
 0x19c   :  { %4955 = vmatpush3.msra.mxu0 %v6566_v3 }
 0x19d   :  { %4882 = vmatmul.mubr.f32.gmra.mxu0 %v6228_v16  ;;  %4944 = vmatmul.mubr.f32.gmra.mxu1 %v6307_v18  ;;  %v6571_v16 = vand.u32 4294901760, %v6564_v57  ;;  %7849 = vst [vmem:[#allocation5_spill] sm:$0xff] %v6574_v36  ;;  %7879 = vst [vmem:[#allocation42_spill] sm:$0xff] %v6691_v45 }
 0x19e   :  { %4884 = vmatprep.mubr.f32.mxu0 %v6267_v44  ;;  %4946 = vmatprep.mubr.f32.mxu1 %v6324_v52  ;;  %v6576_v44 = vand.u32 4294901760, %v2600_v22 }
 0x19f   :  { %7848 = vst [vmem:[#allocation13_spill] sm:$0xff] %v6571_v16 }
 0x1a0   :  { %7850 = vst [vmem:[#allocation52_spill] sm:$0xff] %v6576_v44  ;;  %v6586_v2 = vsub.f32 %v2600_v22, %v6576_v44  ;;  %4956 = vmatprep.subr.mxu0 %v6576_v44  ;;  %v6693_v22 = vand.u32 4294901760, %v2590_v40 }
 0x1a1   :  { %4885 = vmatmul.mubr.f32.gmra.mxu0 %v6271_v30  ;;  %4947 = vmatmul.mubr.f32.gmra.mxu1 %v6335_v59  ;;  %v2599_v30 = vld [vmem:[#allocation2 + $0x60] sm:$0xff] }
 0x1a2   :  { %4887 = vmatprep.mubr.f32.mxu0 %v6295_v10  ;;  %4949 = vmatprep.mubr.f32.mxu1 %v6352_v42  ;;  %v2855_v10 = vsub.f32 %v6564_v57, %v6571_v16  ;;  %7852 = vst [vmem:[#allocation15_spill] sm:$0xff] %v6586_v2  ;;  %v6588_v21 = vand.u32 4294901760, %v2599_v30  ;;  %v6595_v50 = vand.u32 4294901760, %v6586_v2  ;;  %7880 = vst [vmem:[#allocation46_spill] sm:$0xff] %v6693_v22 }
 0x1a3   :  { %4957 = vmatpush3.msra.mxu0 %v6576_v44 }
 0x1a4   :  { %7853 = vst [vmem:[#allocation55_spill] sm:$0xff] %v6588_v21  ;;  %v2856_v39 = vand.u32 4294901760, %v2855_v10  ;;  %7854 = vst [vmem:[#allocation57_spill] sm:$0xff] %v6595_v50  ;;  %4958 = vmatprep.subr.mxu0 %v6588_v21  ;;  %v2589_v10 = vld [vmem:[#allocation2 + $0x10] sm:$0xff] }
 0x1a5   :  { %4888 = vmatmul.mubr.f32.gmra.mxu0 %v6307_v18  ;;  %4950 = vmatmul.mubr.f32.gmra.mxu1 %v6363_v34  ;;  %v6583_v18 = vand.u32 4294901760, %v6574_v36  ;;  %v6707_v48 = vand.u32 4294901760, %v2589_v10 }
 0x1a6   :  { %4890 = vmatprep.mubr.f32.mxu0 %v6324_v52  ;;  %v2598_v52 = vld [vmem:[#allocation2 + $0x58] sm:$0xff]  ;;  %4959 = vmatpush3.msra.mxu0 %v6588_v21 }
 0x1a7   :  { %7851 = vst [vmem:[#allocation7_spill] sm:$0xff] %v6583_v18  ;;  %v2862_v17 = vsub.f32 %v6574_v36, %v6583_v18  ;;  %v6601_v41 = vand.u32 4294901760, %v2598_v52  ;;  %5008 = vmatprep.subr.mxu1 %v2856_v39  ;;  %7883 = vst [vmem:[#allocation8_spill] sm:$0xff] %v6707_v48 }
 0x1a8   :  { %5009 = vmatpush3.msra.mxu1 %v2856_v39  ;;  %v6702_v39 = vand.u32 4294901760, %v6691_v45 }
 0x1a9   :  { %4891 = vmatmul.mubr.f32.gmra.mxu0 %v6335_v59  ;;  %v6598_v59 = vsub.f32 %v2599_v30, %v6588_v21  ;;  %7856 = vst [vmem:[#allocation9_spill] sm:$0xff] %v6601_v41  ;;  %v2863_v20 = vand.u32 4294901760, %v2862_v17  ;;  %4960 = vmatprep.subr.mxu0 %v6601_v41  ;;  %v2918_v30 = vsub.f32 %v6672_v61, %v6684_v43 }
 0x1aa   :  { %4893 = vmatprep.mubr.f32.mxu0 %v6352_v42  ;;  %v2869_v42 = vsub.f32 %v6586_v2, %v6595_v50  ;;  %4961 = vmatpush3.msra.mxu0 %v6601_v41  ;;  %7881 = vst [vmem:[#allocation47_spill] sm:$0xff] %v6702_v39  ;;  %v6705_v17 = vsub.f32 %v2590_v40, %v6693_v22 }
 0x1ab   :  { %7855 = vst [vmem:[#allocation56_spill] sm:$0xff] %v6598_v59  ;;  %v6607_v29 = vand.u32 4294901760, %v6598_v59  ;;  %5010 = vmatprep.subr.mxu1 %v2863_v20  ;;  %4962 = vmatprep.subr.mxu0 %v6609_v54  ;;  %v2932_v51 = vsub.f32 %v6691_v45, %v6702_v39  ;;  %v6794_v39 = vld [vmem:[%s7530_s4] ss:$0 sm:$0xff] }
 0x1ac   :  { %v2870_v32 = vand.u32 4294901760, %v2869_v42  ;;  %5011 = vmatpush3.msra.mxu1 %v2863_v20  ;;  %4963 = vmatpush3.msra.mxu0 %v6609_v54  ;;  %7882 = vst [vmem:[#allocation6_spill] sm:$0xff] %v6705_v17  ;;  %v2919_v20 = vand.u32 4294901760, %v2918_v30 }
 0x1ad   :  { %4894 = vmatmul.mubr.f32.gmra.mxu0 %v6363_v34  ;;  %7857 = vst [vmem:[#allocation18_spill] sm:$0xff] %v6607_v29  ;;  %v6612_v34 = vsub.f32 %v2598_v52, %v6601_v41  ;;  %v2876_v38 = vsub.f32 %v6598_v59, %v6607_v29  ;;  %4964 = vmatprep.subr.mxu0 %v6620_v0 }
 0x1ae   :  { %5012 = vmatprep.subr.mxu1 %v2870_v32  ;;  %4965 = vmatpush3.msra.mxu0 %v6620_v0  ;;  %v2925_v52 = vsub.f32 %v6678_v37, %v6688_v26 }
 0x1af   :  { %7859 = vst [vmem:[#allocation54_spill] sm:$0xff] %v6612_v34  ;;  %v6624_v49 = vand.u32 4294901760, %v6612_v34  ;;  %v2877_v7 = vand.u32 4294901760, %v2876_v38  ;;  %5013 = vmatpush3.msra.mxu1 %v2870_v32  ;;  %4966 = vmatprep.subr.mxu0 %v6633_v60  ;;  %v6714_v32 = vand.u32 4294901760, %v6705_v17  ;;  %v6717_v38 = vsub.f32 %v2589_v10, %v6707_v48 }
 0x1b0   :  { %4967 = vmatpush3.msra.mxu0 %v6633_v60  ;;  %v2926_v42 = vand.u32 4294901760, %v2925_v52 }
 0x1b1   :  { %7862 = vst [vmem:[#allocation16_spill] sm:$0xff] %v6624_v49  ;;  %v2883_v27 = vsub.f32 %v6612_v34, %v6624_v49  ;;  %5014 = vmatprep.subr.mxu1 %v2877_v7  ;;  %4968 = vmatprep.subr.mxu0 %v6647_v24  ;;  %7884 = vst [vmem:[#allocation11_spill] sm:$0xff] %v6714_v32  ;;  %v2939_v12 = vsub.f32 %v6705_v17, %v6714_v32  ;;  %v6726_v62 = vand.u32 4294901760, %v6717_v38 }
 0x1b2   :  { %5015 = vmatpush3.msra.mxu1 %v2877_v7  ;;  %4969 = vmatpush3.msra.mxu0 %v6647_v24  ;;  %7885 = vst [vmem:[#allocation14_spill] sm:$0xff] %v6717_v38  ;;  %v6720_v7 = vand.u32 4294901760, %v2588_v25 }
 0x1b3   :  { %v2884_v23 = vand.u32 4294901760, %v2883_v27  ;;  %4970 = vmatprep.subr.mxu0 %v6660_v8  ;;  %v2933_v27 = vand.u32 4294901760, %v2932_v51  ;;  %7887 = vst [vmem:[#allocation20_spill] sm:$0xff] %v6726_v62  ;;  %v2940_v5 = vand.u32 4294901760, %v2939_v12  ;;  %v2946_v31 = vsub.f32 %v6717_v38, %v6726_v62 }
 0x1b4   :  { %4971 = vmatpush3.msra.mxu0 %v6660_v8  ;;  %7886 = vst [vmem:[#allocation19_spill] sm:$0xff] %v6720_v7  ;;  %v6730_v9 = vsub.f32 %v2588_v25, %v6720_v7 }
 0x1b5   :  { %5016 = vmatprep.subr.mxu1 %v2884_v23  ;;  %4972 = vmatprep.subr.mxu0 %v6668_v28  ;;  %v2947_v19 = vand.u32 4294901760, %v2946_v31 }
 0x1b6   :  { %5017 = vmatpush3.msra.mxu1 %v2884_v23  ;;  %4973 = vmatpush3.msra.mxu0 %v6668_v28  ;;  %v2587_v23 = vld [vmem:[#allocation2] sm:$0xff]  ;;  %7888 = vst [vmem:[#allocation23_spill] sm:$0xff] %v6730_v9 }
 0x1b7   :  { %5018 = vmatprep.subr.mxu1 %v2891_v11  ;;  %4974 = vmatprep.subr.mxu0 %v6680_v6 }
 0x1b8   :  { %5019 = vmatpush3.msra.mxu1 %v2891_v11  ;;  %4975 = vmatpush3.msra.mxu0 %v6680_v6  ;;  %v6732_v11 = vand.u32 4294901760, %v2587_v23 }
 0x1b9   :  { %5020 = vmatprep.subr.mxu1 %v2898_v63  ;;  %4976 = vmatprep.subr.mxu0 %v6693_v22 }
 0x1ba   :  { %5021 = vmatpush3.msra.mxu1 %v2898_v63  ;;  %4977 = vmatpush3.msra.mxu0 %v6693_v22  ;;  %7889 = vst [vmem:[#allocation26_spill] sm:$0xff] %v6732_v11  ;;  %v6739_v63 = vand.u32 4294901760, %v6730_v9  ;;  %v6742_v14 = vsub.f32 %v2587_v23, %v6732_v11 }
 0x1bb   :  { %5022 = vmatprep.subr.mxu1 %v2905_v1  ;;  %4978 = vmatprep.subr.mxu0 %v6707_v48 }
 0x1bc   :  { %5023 = vmatpush3.msra.mxu1 %v2905_v1  ;;  %4979 = vmatpush3.msra.mxu0 %v6707_v48  ;;  %7890 = vst [vmem:[#allocation29_spill] sm:$0xff] %v6739_v63  ;;  %7891 = vst [vmem:[#allocation34_spill] sm:$0xff] %v6742_v14  ;;  %v2953_v1 = vsub.f32 %v6730_v9, %v6739_v63  ;;  %v6749_v55 = vand.u32 4294901760, %v6742_v14 }
 0x1bd   :  { %5024 = vmatprep.subr.mxu1 %v2912_v58  ;;  %4980 = vmatprep.subr.mxu0 %v6720_v7 }
 0x1be   :  { %5025 = vmatpush3.msra.mxu1 %v2912_v58  ;;  %4981 = vmatpush3.msra.mxu0 %v6720_v7  ;;  %7892 = vst [vmem:[#allocation35_spill] sm:$0xff] %v6749_v55  ;;  %v2954_v40 = vand.u32 4294901760, %v2953_v1  ;;  %v2960_v58 = vsub.f32 %v6742_v14, %v6749_v55 }
 0x1bf   :  { %5026 = vmatprep.subr.mxu1 %v2919_v20  ;;  %4982 = vmatprep.subr.mxu0 %v6732_v11 }
 0x1c0   :  { %5027 = vmatpush3.msra.mxu1 %v2919_v20  ;;  %4983 = vmatpush3.msra.mxu0 %v6732_v11  ;;  %v2961_v30 = vand.u32 4294901760, %v2960_v58 }
 0x1c1   :  { %5028 = vmatprep.subr.mxu1 %v2926_v42  ;;  %5064 = vmatprep.subr.mxu0 %v6564_v57 }
 0x1c2   :  { %5029 = vmatpush3.msra.mxu1 %v2926_v42 }
 0x1c3   :  { %5030 = vmatprep.subr.mxu1 %v2933_v27 }
 0x1c4   :  { %5031 = vmatpush3.msra.mxu1 %v2933_v27 }
 0x1c5   :  { %5032 = vmatprep.subr.mxu1 %v2940_v5 }
 0x1c6   :  { %5033 = vmatpush3.msra.mxu1 %v2940_v5 }
 0x1c7   :  { %5034 = vmatprep.subr.mxu1 %v2947_v19 }
 0x1c8   :  { %5035 = vmatpush3.msra.mxu1 %v2947_v19 }
 0x1c9   :  { %5036 = vmatprep.subr.mxu1 %v2954_v40 }
 0x1ca   :  { %5037 = vmatpush3.msra.mxu1 %v2954_v40 }
 0x1cb   :  { %5038 = vmatprep.subr.mxu1 %v2961_v30 }
 0x1cc   :  { %5039 = vmatpush3.msra.mxu1 %v2961_v30 }
 0x1cd   :  { %5120 = vmatprep.subr.mxu1 %v6561_v35 }
 0x1eb   :  { %v6755_v10 = vpop.f32.mrf.mxu1 }
 0x1ed   :  { %v6757_v52 = vpop.f32.mrf.mxu1 }
 0x1ef   :  { %v6759_v20 = vpop.f32.mrf.mxu1 }
 0x1f1   :  { %v6761_v42 = vpop.f32.mrf.mxu1 }
 0x1f3   :  { %v6763_v51 = vpop.f32.mrf.mxu0 }
 0x1f4   :  { %v6765_v25 = vpop.f32.mrf.mxu1  ;;  %v1383_v2 = vadd.f32 %v6763_v51, %v6794_v39 }
 0x1f5   :  { %v6767_v27 = vpop.f32.mrf.mxu0 }
 0x1f6   :  { %v6769_v12 = vpop.f32.mrf.mxu1  ;;  %v1680_v41 = vadd.f32 %v6755_v10, %v1383_v2 }
 0x1f9   :  { %v6771_v23 = vpop.f32.mrf.mxu0  ;;  %v6773_v5 = vpop.f32.mrf.mxu1 }
 0x1fa   :  { %v1403_v57 = vadd.f32 %v6771_v23, %v6794_v39 }
 0x1fb   :  { %v6775_v31 = vpop.f32.mrf.mxu0  ;;  %v6777_v19 = vpop.f32.mrf.mxu1 }
 0x1fc   :  { %v1393_v21 = vadd.f32 %v6794_v39, %v6775_v31  ;;  %v1692_v10 = vadd.f32 %v6759_v20, %v1403_v57 }
 0x1ff   :  { %v6779_v1 = vpop.f32.mrf.mxu0  ;;  %v4718_v40 = vpop.f32.mrf.mxu1 }
 0x201   :  { %v6781_v58 = vpop.f32.mrf.mxu0  ;;  %v6783_v30 = vpop.f32.mrf.mxu1 }
 0x202   :  { %v1413_v51 = vadd.f32 %v6794_v39, %v6781_v58 }
 0x205   :  { %v6785_v55 = vpop.f32.mrf.mxu0  ;;  %v4721_v63 = vpop.f32.mrf.mxu1 }
 0x206   :  { %v1443_v23 = vadd.f32 %v6785_v55, %v6794_v39  ;;  %v1698_v55 = vadd.f32 %v6769_v12, %v1413_v51 }
 0x207   :  { %v6787_v62 = vpop.f32.mrf.mxu0  ;;  %v6789_v32 = vpop.f32.mrf.mxu1 }
 0x208   :  { %v1433_v31 = vadd.f32 %v6794_v39, %v6787_v62  ;;  %v1716_v62 = vadd.f32 %v6773_v5, %v1443_v23 }
 0x20b   :  { %v4662_v26 = vpop.f32.mrf.mxu0  ;;  %v4724_v33 = vpop.f32.mrf.mxu1 }
 0x20c   :  { %v1463_v43 = vadd.f32 %v4662_v26, %v6794_v39 }
 0x20d   :  { %v6797_v56 = vpop.f32.mrf.mxu0  ;;  %v1745_v4 = vpop.f32.mrf.mxu1 }
 0x20e   :  { %v6799_v53 = vadd.f32 %v4718_v40, %v1463_v43 }
 0x211   :  { %v4665_v49 = vpop.f32.mrf.mxu0  ;;  %v4727_v50 = vpop.f32.mrf.mxu1 }
 0x212   :  { %v1483_v29 = vadd.f32 %v4665_v49, %v6794_v39 }
 0x213   :  { %v6802_v18 = vpop.f32.mrf.mxu0  ;;  %v1757_v16 = vpop.f32.mrf.mxu1 }
 0x214   :  { %v6804_v14 = vadd.f32 %v4721_v63, %v1483_v29  ;;  %v1473_v57 = vadd.f32 %v6794_v39, %v6802_v18 }
 0x217   :  { %v4668_v9 = vpop.f32.mrf.mxu0 }
 0x218   :  { %v1503_v38 = vadd.f32 %v4668_v9, %v6794_v39  ;;  %v6807_v17 = vpop.f32.mrf.mxu1 }
 0x219   :  { %v1492_v26 = vpop.f32.mrf.mxu0 }
 0x21a   :  { %v1493_v11 = vadd.f32 %v6794_v39, %v1492_v26  ;;  %v6810_v45 = vpop.f32.mrf.mxu1  ;;  %v6812_v43 = vadd.f32 %v4724_v33, %v1503_v38 }
 0x21c   :  { %v6814_v40 = vadd.f32 %v1745_v4, %v1493_v11 }
 0x21d   :  { %v4671_v49 = vpop.f32.mrf.mxu0 }
 0x21e   :  { %v1523_v7 = vadd.f32 %v4671_v49, %v6794_v39  ;;  %v6817_v37 = vpop.f32.mrf.mxu1 }
 0x21f   :  { %v1512_v29 = vpop.f32.mrf.mxu0 }
 0x220   :  { %v1513_v63 = vadd.f32 %v6794_v39, %v1512_v29  ;;  %v6820_v9 = vpop.f32.mrf.mxu1  ;;  %v6822_v48 = vadd.f32 %v4727_v50, %v1523_v7 }
 0x222   :  { %7893 = vst [vmem:[#allocation38_spill] sm:$0xff] %v6822_v48  ;;  %v6824_v61 = vadd.f32 %v1757_v16, %v1513_v63 }
 0x223   :  { %v4762_v26 = vpop.f32.mrf.mxu0  ;;  %v6826_v22 = vpop.f32.mrf.mxu1 }
 0x224   :  { %7894 = vst [vmem:[#allocation41_spill] sm:$0xff] %v6824_v61  ;;  %v1373_v61 = vadd.f32 %v6794_v39, %v6767_v27  ;;  %v1875_v44 = vadd.f32 %v4762_v26, %v1680_v41 }
 0x225   :  { %v1867_v33 = vpop.f32.mrf.mxu0  ;;  %v6828_v4 = vpop.f32.mrf.mxu1 }
 0x226   :  { %v1674_v27 = vadd.f32 %v6757_v52, %v1373_v61  ;;  %v1453_v61 = vadd.f32 %v6794_v39, %v6797_v56  ;;  %v2070_v26 = vadd.f32 %v6807_v17, %v1875_v44  ;;  %v1710_v56 = vadd.f32 %v6777_v19, %v1433_v31 }
 0x228   :  { %v1868_v2 = vadd.f32 %v1867_v33, %v1674_v27  ;;  %v1722_v44 = vadd.f32 %v6783_v30, %v1453_v61 }
 0x229   :  { %v4765_v38 = vpop.f32.mrf.mxu0  ;;  %v6830_v11 = vpop.f32.mrf.mxu1 }
 0x22a   :  { %v1889_v52 = vadd.f32 %v4765_v38, %v1692_v10 }
 0x22b   :  { %v1881_v49 = vpop.f32.mrf.mxu0  ;;  %v6832_v47 = vpop.f32.mrf.mxu1 }
 0x22c   :  { %v2086_v18 = vadd.f32 %v6817_v37, %v1889_v52 }
 0x22f   :  { %v4768_v6 = vpop.f32.mrf.mxu0  ;;  %v6834_v29 = vpop.f32.mrf.mxu1 }
 0x231   :  { %v1895_v15 = vpop.f32.mrf.mxu0  ;;  %v6836_v50 = vpop.f32.mrf.mxu1 }
 0x235   :  { %v4771_v16 = vpop.f32.mrf.mxu0  ;;  %v6838_v7 = vpop.f32.mrf.mxu1 }
 0x237   :  { %v1909_v63 = vpop.f32.mrf.mxu0  ;;  %v6840_v28 = vpop.f32.mrf.mxu1 }
 0x23b   :  { %v4774_v13 = vpop.f32.mrf.mxu0  ;;  %v6842_v8 = vpop.f32.mrf.mxu1 }
 0x23c   :  { %v1931_v30 = vadd.f32 %v4774_v13, %v6799_v53 }
 0x23d   :  { %v1923_v46 = vpop.f32.mrf.mxu0  ;;  %v6844_v24 = vpop.f32.mrf.mxu1 }
 0x23e   :  { %7895 = vst [vmem:[#allocation44_spill] sm:$0xff] %v6844_v24 }
 0x241   :  { %v4777_v34 = vpop.f32.mrf.mxu0  ;;  %v6846_v60 = vpop.f32.mrf.mxu1 }
 0x242   :  { %7896 = vst [vmem:[#allocation48_spill] sm:$0xff] %v6846_v60  ;;  %v1945_v10 = vadd.f32 %v4777_v34, %v6804_v14 }
 0x243   :  { %v6848_v59 = vpop.f32.mrf.mxu0  ;;  %v6850_v0 = vpop.f32.mrf.mxu1 }
 0x244   :  { %7897 = vst [vmem:[#allocation49_spill] sm:$0xff] %v6850_v0  ;;  %v1423_v0 = vadd.f32 %v6779_v1, %v6794_v39  ;;  %v1686_v1 = vadd.f32 %v6761_v42, %v1393_v21  ;;  %v1896_v42 = vadd.f32 %v1895_v15, %v1698_v55  ;;  %v1734_v39 = vadd.f32 %v6789_v32, %v1473_v57 }
 0x246   :  { %v1704_v41 = vadd.f32 %v6765_v25, %v1423_v0  ;;  %v1882_v20 = vadd.f32 %v1881_v49, %v1686_v1  ;;  %v2062_v25 = vadd.f32 %v6810_v45, %v1868_v2  ;;  %v2094_v2 = vadd.f32 %v6828_v4, %v1896_v42 }
 0x247   :  { %v6854_v54 = vpop.f32.mrf.mxu0 }
 0x248   :  { %v4930_v36 = vpop.f32.mrf.mxu1  ;;  %v1903_v33 = vadd.f32 %v4768_v6, %v1704_v41  ;;  %v1910_v6 = vadd.f32 %v1909_v63, %v1710_v56  ;;  %v2078_v15 = vadd.f32 %v6820_v9, %v1882_v20  ;;  %v7901_v56 = vld [vmem:[#allocation53_spill] sm:$0xff] }
 0x249   :  { %v1951_v48 = vpop.f32.mrf.mxu0 }
 0x24a   :  { %v2477_v60 = vpop.f32.mrf.mxu1  ;;  %v2102_v45 = vadd.f32 %v6826_v22, %v1903_v33  ;;  %v1938_v22 = vadd.f32 %v6848_v59, %v1734_v39  ;;  %v1952_v4 = vadd.f32 %v1951_v48, %v6814_v40  ;;  %v2110_v34 = vadd.f32 %v6832_v47, %v1910_v6 }
 0x24b   :  { %v2134_v59 = vadd.f32 %v6834_v29, %v1931_v30  ;;  %v6914_v48 = vadd.f32 %v6838_v7, %v1945_v10 }
 0x24c   :  { %v6868_v3 = vpop.f32.mrf.mxu0  ;;  %v6925_v29 = vadd.f32 %v6840_v28, %v1938_v22 }
 0x24d   :  { %v4933_v24 = vpop.f32.mrf.mxu1 }
 0x24e   :  { %v6873_v35 = vpop.f32.mrf.mxu0 }
 0x24f   :  { %7898 = vst [vmem:[#allocation58_spill] sm:$0xff] %v6873_v35  ;;  %v2489_v58 = vpop.f32.mrf.mxu1  ;;  %v1917_v35 = vadd.f32 %v4771_v16, %v1716_v62 }
 0x251   :  { %v4874_v27 = vpop.f32.mrf.mxu0  ;;  %v4936_v21 = vpop.f32.mrf.mxu1  ;;  %v2118_v32 = vadd.f32 %v6830_v11, %v1917_v35 }
 0x252   :  { %v2307_v0 = vadd.f32 %v4874_v27, %v2070_v26  ;;  %v7899_v27 = vld [vmem:[#allocation51_spill] sm:$0xff] }
 0x253   :  { %v2300_v38 = vpop.f32.mrf.mxu0  ;;  %v2501_v12 = vpop.f32.mrf.mxu1 }
 0x254   :  { %v2484_v17 = vadd.f32 %v4930_v36, %v2307_v0  ;;  %v2301_v51 = vadd.f32 %v2300_v38, %v2062_v25  ;;  %v1924_v36 = vadd.f32 %v1923_v46, %v1722_v44 }
 0x255   :  { %v4877_v5 = vpop.f32.mrf.mxu0  ;;  %v4939_v49 = vpop.f32.mrf.mxu1 }
 0x256   :  { %v2572_v16 = vmax.f32 %v2484_v17, 0.0  ;;  %v2478_v23 = vadd.f32 %v2477_v60, %v2301_v51  ;;  %v2319_v19 = vadd.f32 %v4877_v5, %v2086_v18  ;;  %v1959_v60 = vadd.f32 %v6854_v54, %v6812_v43 }
 0x257   :  { %v2312_v37 = vpop.f32.mrf.mxu0  ;;  %v2513_v63 = vpop.f32.mrf.mxu1  ;;  %v2126_v54 = vadd.f32 %v6836_v50, %v1924_v36 }
 0x258   :  { %v6897_v31 = vand.u32 4294901760, %v2572_v16  ;;  %v2571_v1 = vmax.f32 %v2478_v23, 0.0  ;;  %v2496_v9 = vadd.f32 %v4933_v24, %v2319_v19  ;;  %v2313_v41 = vadd.f32 %v2312_v37, %v2078_v15  ;;  %v7903_v37 = vld [vmem:[#allocation55_spill] sm:$0xff] }
 0x259   :  { %v4880_v53 = vpop.f32.mrf.mxu0  ;;  %v4942_v46 = vpop.f32.mrf.mxu1  ;;  %v6928_v50 = vadd.f32 %v6842_v8, %v1959_v60 }
 0x25a   :  { %v6905_v13 = vsub.f32 %v2572_v16, %v6897_v31  ;;  %v6907_v35 = vand.u32 4294901760, %v2571_v1  ;;  %v2574_v14 = vmax.f32 %v2496_v9, 0.0  ;;  %v2490_v11 = vadd.f32 %v2489_v58, %v2313_v41 }
 0x25b   :  { %v2331_v24 = vadd.f32 %v4880_v53, %v2102_v45  ;;  %v2324_v61 = vpop.f32.mrf.mxu0  ;;  %v6909_v52 = vpop.f32.mrf.mxu1 }
 0x25c   :  { %v2703_v47 = vand.u32 4294901760, %v6905_v13  ;;  %v6918_v43 = vsub.f32 %v2571_v1, %v6907_v35  ;;  %v6920_v40 = vand.u32 4294901760, %v2574_v14  ;;  %v2573_v55 = vmax.f32 %v2490_v11, 0.0  ;;  %5040 = vmatprep.mubr.f32.mxu1 %v6907_v35 }
 0x25d   :  { %v2508_v58 = vadd.f32 %v4936_v21, %v2331_v24  ;;  %v2325_v26 = vadd.f32 %v2324_v61, %v2094_v2  ;;  %v4883_v57 = vpop.f32.mrf.mxu0  ;;  %5041 = vmatmul.mubr.f32.vlgmr.msra.gmra.mxu1 %v6897_v31  ;;  %v6935_v62 = vpop.f32.mrf.mxu1  ;;  %v7900_v21 = vld [vmem:[#allocation44_spill] sm:$0xff] }
 0x25e   :  { %v6931_v7 = vsub.f32 %v2574_v14, %v6920_v40  ;;  %v6933_v20 = vand.u32 4294901760, %v2573_v55  ;;  %v2343_v33 = vadd.f32 %v4883_v57, %v2118_v32  ;;  %5121 = vmatpush3.msra.mxu1 %v7899_v27  ;;  %v6939_v42 = vadd.f32 %v7900_v21, %v1952_v4 }
 0x25f   :  { %v2704_v28 = vsub.f32 %v6905_v13, %v2703_v47  ;;  %v2576_v0 = vmax.f32 %v2508_v58, 0.0  ;;  %v2502_v8 = vadd.f32 %v2501_v12, %v2325_v26  ;;  %v2336_v25 = vpop.f32.mrf.mxu0  ;;  %5122 = vmatprep.subr.mxu1 %v7901_v56  ;;  %v2693_v38 = vand.u32 4294901760, %v6918_v43  ;;  %v7902_v12 = vld [vmem:[#allocation52_spill] sm:$0xff]  ;;  %v2537_v16 = vpop.f32.mrf.mxu1 }
 0x260   :  { %v6947_v44 = vsub.f32 %v2573_v55, %v6933_v20  ;;  %v2520_v17 = vadd.f32 %v4939_v49, %v2343_v33  ;;  %v2337_v51 = vadd.f32 %v2336_v25, %v2110_v34  ;;  %5043 = vmatprep.mubr.f32.mxu1 %v6933_v20  ;;  %5123 = vmatpush3.msra.mxu1 %v7901_v56  ;;  %v2723_v15 = vand.u32 4294901760, %v6931_v7  ;;  %v7905_v55 = vld [vmem:[#allocation10_spill] sm:$0xff] }
 0x261   :  { %v6951_v18 = vand.u32 4294901760, %v2576_v0  ;;  %v2575_v6 = vmax.f32 %v2502_v8, 0.0  ;;  %v4886_v39 = vpop.f32.mrf.mxu0  ;;  %5044 = vmatmul.mubr.f32.gmra.mxu1 %v6920_v40  ;;  %5124 = vmatprep.subr.mxu1 %v7902_v12  ;;  %v2694_v5 = vsub.f32 %v6918_v43, %v2693_v38  ;;  %v2705_v2 = vand.u32 4294901760, %v2704_v28  ;;  %v4948_v14 = vpop.f32.mrf.mxu1  ;;  %v7906_v33 = vld [vmem:[#allocation38_spill] sm:$0xff]  ;;  %v7908_v8 = vld [vmem:[#allocation41_spill] sm:$0xff] }
 0x262   :  { %v2578_v49 = vmax.f32 %v2520_v17, 0.0  ;;  %v2514_v45 = vadd.f32 %v2513_v63, %v2337_v51  ;;  %v2355_v23 = vadd.f32 %v4886_v39, %v2134_v59  ;;  %5125 = vmatpush3.msra.mxu1 %v7902_v12  ;;  %v2713_v19 = vand.u32 4294901760, %v6947_v44  ;;  %v7909_v25 = vld [vmem:[#allocation58_spill] sm:$0xff] }
 0x263   :  { %v6962_v30 = vsub.f32 %v2576_v0, %v6951_v18  ;;  %v6964_v36 = vand.u32 4294901760, %v2575_v6  ;;  %v2348_v10 = vpop.f32.mrf.mxu0  ;;  %5126 = vmatprep.subr.mxu1 %v7903_v37  ;;  %v2695_v32 = vand.u32 4294901760, %v2694_v5  ;;  %v2724_v53 = vsub.f32 %v6931_v7, %v2723_v15 }
 0x264   :  { %v6967_v1 = vand.u32 4294901760, %v2578_v49  ;;  %v2577_v9 = vmax.f32 %v2514_v45, 0.0  ;;  %v6969_v63 = vadd.f32 %v4942_v46, %v2355_v23  ;;  %v2349_v41 = vadd.f32 %v2348_v10, %v2126_v54  ;;  %5127 = vmatpush3.msra.mxu1 %v7903_v37  ;;  %v7904_v54 = vld [vmem:[#allocation9_spill] sm:$0xff]  ;;  %v2549_v45 = vpop.f32.mrf.mxu1 }
 0x265   :  { %v6973_v22 = vsub.f32 %v2575_v6, %v6964_v36  ;;  %4984 = vmatprep.mubr.f32.mxu0 %v2695_v32  ;;  %5046 = vmatprep.mubr.f32.mxu1 %v6964_v36  ;;  %v4889_v60 = vpop.f32.mrf.mxu0  ;;  %v2714_v4 = vsub.f32 %v6947_v44, %v2713_v19  ;;  %v2743_v24 = vand.u32 4294901760, %v6962_v30  ;;  %v1966_v17 = vadd.f32 %v7909_v25, %v7908_v8  ;;  %v7910_v6 = vld [vmem:[#allocation50_spill] sm:$0xff] }
 0x266   :  { %v6982_v46 = vand.u32 4294901760, %v2577_v9  ;;  %v2580_v34 = vmax.f32 %v6969_v63, 0.0  ;;  %v2526_v11 = vadd.f32 %v6909_v52, %v2349_v41  ;;  %4985 = vmatmul.mubr.f32.vlgmr.msra.gmra.mxu0 %v2705_v2  ;;  %5047 = vmatmul.mubr.f32.gmra.mxu1 %v6951_v18  ;;  %v6989_v61 = vsub.f32 %v2578_v49, %v6967_v1 }
 0x267   :  { %v2367_v59 = vadd.f32 %v4889_v60, %v6914_v48  ;;  %5128 = vmatprep.subr.mxu1 %v7904_v54  ;;  %5065 = vmatpush3.msra.mxu0 %v7905_v55  ;;  %v2360_v58 = vpop.f32.mrf.mxu0  ;;  %v2715_v26 = vand.u32 4294901760, %v2714_v4  ;;  %v2733_v57 = vand.u32 4294901760, %v6973_v22  ;;  %v1973_v52 = vadd.f32 %v6868_v3, %v7906_v33  ;;  %v7907_v48 = vld [vmem:[#allocation5_spill] sm:$0xff]  ;;  %v7911_v4 = vld [vmem:[#allocation15_spill] sm:$0xff]  ;;  %v4951_v55 = vpop.f32.mrf.mxu1  ;;  %v7913_v33 = vld [vmem:[#allocation56_spill] sm:$0xff] }
 0x268   :  { %v6998_v21 = vsub.f32 %v2577_v9, %v6982_v46  ;;  %v2579_v28 = vmax.f32 %v2526_v11, 0.0  ;;  %5129 = vmatpush3.msra.mxu1 %v7904_v54  ;;  %v2361_v0 = vadd.f32 %v2360_v58, %v6925_v29  ;;  %5066 = vmatprep.subr.mxu0 %v7907_v48  ;;  %v2725_v39 = vand.u32 4294901760, %v2724_v53 }
 0x269   :  { %v7006_v51 = vadd.f32 %v6935_v62, %v2367_v59  ;;  %5130 = vmatprep.subr.mxu1 %v7910_v6  ;;  %4987 = vmatprep.mubr.f32.mxu0 %v2715_v26  ;;  %v4892_v3 = vpop.f32.mrf.mxu0  ;;  %v2734_v5 = vsub.f32 %v6973_v22, %v2733_v57  ;;  %v7012_v49 = vand.u32 4294901760, %v2580_v34  ;;  %v2744_v62 = vsub.f32 %v6962_v30, %v2743_v24 }
 0x26a   :  { %v7014_v29 = vand.u32 4294901760, %v2579_v28  ;;  %v2538_v23 = vadd.f32 %v2537_v16, %v2361_v0  ;;  %5049 = vmatprep.mubr.f32.mxu1 %v6982_v46  ;;  %5067 = vmatpush3.msra.mxu0 %v7907_v48  ;;  %v2379_v2 = vadd.f32 %v4892_v3, %v6928_v50  ;;  %v2753_v9 = vand.u32 4294901760, %v6998_v21  ;;  %v7912_v50 = vld [vmem:[#allocation22_spill] sm:$0xff] }
 0x26b   :  { %5131 = vmatpush3.msra.mxu1 %v7910_v6  ;;  %4988 = vmatmul.mubr.f32.gmra.mxu0 %v2725_v39  ;;  %v2372_v10 = vpop.f32.mrf.mxu0  ;;  %v2735_v32 = vand.u32 4294901760, %v2734_v5  ;;  %v2763_v63 = vand.u32 4294901760, %v6989_v61  ;;  %v2582_v41 = vmax.f32 %v7006_v51, 0.0  ;;  %v7044_v8 = vsub.f32 %v2580_v34, %v7012_v49  ;;  %v7916_v51 = vld [vmem:[#allocation28_spill] sm:$0xff] }
 0x26c   :  { %v7026_v16 = vsub.f32 %v2579_v28, %v7014_v29  ;;  %v2581_v60 = vmax.f32 %v2538_v23, 0.0  ;;  %5050 = vmatmul.mubr.f32.gmra.mxu1 %v6967_v1  ;;  %5068 = vmatprep.subr.mxu0 %v7911_v4  ;;  %v2373_v53 = vadd.f32 %v2372_v10, %v6939_v42  ;;  %v2754_v59 = vsub.f32 %v6998_v21, %v2753_v9  ;;  %v7914_v28 = vld [vmem:[#allocation48_spill] sm:$0xff]  ;;  %v7915_v42 = vld [vmem:[#allocation49_spill] sm:$0xff]  ;;  %v7917_v10 = vld [vmem:[#allocation54_spill] sm:$0xff] }
 0x26d   :  { %5132 = vmatprep.subr.mxu1 %v7912_v50  ;;  %5069 = vmatpush3.msra.mxu0 %v7911_v4  ;;  %v4895_v11 = vpop.f32.mrf.mxu0  ;;  %v2182_v0 = vadd.f32 %v7914_v28, %v1973_v52  ;;  %v2174_v48 = vadd.f32 %v7915_v42, %v1966_v17  ;;  %v2556_v25 = vadd.f32 %v4948_v14, %v2379_v2  ;;  %v2745_v3 = vand.u32 4294901760, %v2744_v62  ;;  %v2561_v2 = vpop.f32.mrf.mxu1  ;;  %v7918_v4 = vld [vmem:[#allocation24_spill] sm:$0xff] }
 0x26e   :  { %v7037_v58 = vand.u32 4294901760, %v2581_v60  ;;  %5133 = vmatpush3.msra.mxu1 %v7912_v50  ;;  %v2550_v26 = vadd.f32 %v2549_v45, %v2373_v53  ;;  %5070 = vmatprep.subr.mxu0 %v7913_v33  ;;  %v7729_v5 = vand.u32 4294901760, %v7026_v16  ;;  %v7048_v23 = vand.u32 4294901760, %v2582_v41 }
 0x26f   :  { %5134 = vmatprep.subr.mxu1 %v7916_v51  ;;  %4990 = vmatprep.mubr.f32.mxu0 %v2735_v32  ;;  %v2384_v39 = vpop.f32.mrf.mxu0  ;;  %v2764_v34 = vsub.f32 %v6989_v61, %v2763_v63  ;;  %v2391_v52 = vadd.f32 %v4895_v11, %v2182_v0  ;;  %v2755_v62 = vand.u32 4294901760, %v2754_v59  ;;  %v2584_v32 = vmax.f32 %v2556_v25, 0.0  ;;  %v7919_v59 = vld [vmem:[#allocation12_spill] sm:$0xff]  ;;  %v7920_v0 = vld [vmem:[#allocation37_spill] sm:$0xff] }
 0x270   :  { %v2583_v45 = vmax.f32 %v2550_v26, 0.0  ;;  %5052 = vmatprep.mubr.f32.mxu1 %v7014_v29  ;;  %5071 = vmatpush3.msra.mxu0 %v7913_v33  ;;  %v7056_v14 = vsub.f32 %v2581_v60, %v7037_v58  ;;  %v2385_v17 = vadd.f32 %v2384_v39, %v2174_v48  ;;  %v2774_v60 = vsub.f32 %v7026_v16, %v7729_v5 }
 0x271   :  { %5135 = vmatpush3.msra.mxu1 %v7916_v51  ;;  %4991 = vmatmul.mubr.f32.gmra.mxu0 %v2745_v3  ;;  %v7727_v11 = vand.u32 4294901760, %v7044_v8  ;;  %v7072_v33 = vsub.f32 %v2582_v41, %v7048_v23  ;;  %v2568_v28 = vadd.f32 %v4951_v55, %v2391_v52  ;;  %v2765_v42 = vand.u32 4294901760, %v2764_v34  ;;  %v7921_v34 = vld [vmem:[#allocation17_spill] sm:$0xff] }
 0x272   :  { %5053 = vmatmul.mubr.f32.gmra.mxu1 %v7012_v49  ;;  %5072 = vmatprep.subr.mxu0 %v7917_v10  ;;  %v2562_v53 = vadd.f32 %v2561_v2, %v2385_v17  ;;  %v7067_v26 = vand.u32 4294901760, %v2583_v45  ;;  %v7725_v48 = vand.u32 4294901760, %v7056_v14  ;;  %v7078_v3 = vand.u32 4294901760, %v2584_v32  ;;  %v7922_v17 = vld [vmem:[#allocation40_spill] sm:$0xff] }
 0x273   :  { %5136 = vmatprep.subr.mxu1 %v7918_v4  ;;  %5073 = vmatpush3.msra.mxu0 %v7917_v10  ;;  %v2775_v39 = vand.u32 4294901760, %v2774_v60  ;;  %v2784_v41 = vsub.f32 %v7044_v8, %v7727_v11  ;;  %v2586_v52 = vmax.f32 %v2568_v28, 0.0  ;;  %v7726_v2 = vand.u32 4294901760, %v7072_v33  ;;  %v7924_v60 = vld [vmem:[#allocation36_spill] sm:$0xff] }
 0x274   :  { %5137 = vmatpush3.msra.mxu1 %v7918_v4  ;;  %5074 = vmatprep.subr.mxu0 %v7919_v59  ;;  %v2585_v25 = vmax.f32 %v2562_v53, 0.0  ;;  %v7085_v55 = vsub.f32 %v2583_v45, %v7067_v26  ;;  %v7923_v45 = vld [vmem:[#allocation30_spill] sm:$0xff]  ;;  %v7100_v53 = vsub.f32 %v2584_v32, %v7078_v3 }
 0x275   :  { %5138 = vmatprep.subr.mxu1 %v7920_v0  ;;  %4993 = vmatprep.mubr.f32.mxu0 %v2755_v62  ;;  %v2794_v62 = vsub.f32 %v7056_v14, %v7725_v48  ;;  %v2804_v32 = vsub.f32 %v7072_v33, %v7726_v2  ;;  %v7928_v2 = vld [vmem:[#allocation8_spill] sm:$0xff] }
 0x276   :  { %5055 = vmatprep.mubr.f32.mxu1 %v7037_v58  ;;  %5075 = vmatpush3.msra.mxu0 %v7919_v59  ;;  %v7095_v10 = vand.u32 4294901760, %v2585_v25  ;;  %v2785_v59 = vand.u32 4294901760, %v2784_v41  ;;  %v7728_v28 = vand.u32 4294901760, %v7085_v55  ;;  %v7926_v41 = vld [vmem:[#allocation46_spill] sm:$0xff] }
 0x277   :  { %5139 = vmatpush3.msra.mxu1 %v7920_v0  ;;  %4994 = vmatmul.mubr.f32.gmra.mxu0 %v2765_v42  ;;  %v7106_v42 = vand.u32 4294901760, %v2586_v52  ;;  %v2805_v11 = vand.u32 4294901760, %v2804_v32 }
 0x278   :  { %5056 = vmatmul.mubr.f32.gmra.mxu1 %v7048_v23  ;;  %5076 = vmatprep.subr.mxu0 %v7921_v34  ;;  %v7113_v48 = vsub.f32 %v2585_v25, %v7095_v10 }
 0x279   :  { %5140 = vmatprep.subr.mxu1 %v7922_v17  ;;  %5077 = vmatpush3.msra.mxu0 %v7921_v34  ;;  %v2795_v34 = vand.u32 4294901760, %v2794_v62  ;;  %v7927_v62 = vld [vmem:[#allocation32_spill] sm:$0xff]  ;;  %v7126_v25 = vsub.f32 %v2586_v52, %v7106_v42  ;;  %v7929_v52 = vld [vmem:[#allocation43_spill] sm:$0xff] }
 0x27a   :  { %5141 = vmatpush3.msra.mxu1 %v7922_v17  ;;  %5078 = vmatprep.subr.mxu0 %v7923_v45 }
 0x27b   :  { %5142 = vmatprep.subr.mxu1 %v7924_v60  ;;  %4996 = vmatprep.mubr.f32.mxu0 %v2775_v39  ;;  %v7925_v39 = vld [vmem:[#allocation27_spill] sm:$0xff]  ;;  %v2843_v32 = vand.u32 4294901760, %v7126_v25 }
 0x27c   :  { %5058 = vmatprep.mubr.f32.mxu1 %v7067_v26  ;;  %5079 = vmatpush3.msra.mxu0 %v7923_v45  ;;  %v7730_v45 = vand.u32 4294901760, %v7100_v53 }
 0x27d   :  { %5143 = vmatpush3.msra.mxu1 %v7924_v60  ;;  %4997 = vmatmul.mubr.f32.gmra.mxu0 %v2785_v59  ;;  %v2814_v59 = vsub.f32 %v7085_v55, %v7728_v28 }
 0x27e   :  { %5059 = vmatmul.mubr.f32.gmra.mxu1 %v7078_v3  ;;  %5080 = vmatprep.subr.mxu0 %v7925_v39  ;;  %v2824_v28 = vsub.f32 %v7100_v53, %v7730_v45  ;;  %v7932_v45 = vld [vmem:[#allocation26_spill] sm:$0xff] }
 0x27f   :  { %5144 = vmatprep.subr.mxu1 %v7926_v41  ;;  %5081 = vmatpush3.msra.mxu0 %v7925_v39  ;;  %v7731_v39 = vand.u32 4294901760, %v7113_v48  ;;  %v2815_v5 = vand.u32 4294901760, %v2814_v59 }
 0x280   :  { %5145 = vmatpush3.msra.mxu1 %v7926_v41  ;;  %5082 = vmatprep.subr.mxu0 %v7927_v62  ;;  %v2825_v59 = vand.u32 4294901760, %v2824_v28 }
 0x281   :  { %5146 = vmatprep.subr.mxu1 %v7928_v2  ;;  %4999 = vmatprep.mubr.f32.mxu0 %v2795_v34  ;;  %v7930_v34 = vld [vmem:[#allocation19_spill] sm:$0xff] }
 0x282   :  { %5061 = vmatprep.mubr.f32.mxu1 %v7095_v10  ;;  %5083 = vmatpush3.msra.mxu0 %v7927_v62  ;;  %v7931_v62 = vld [vmem:[#allocation42_spill] sm:$0xff] }
 0x283   :  { %5147 = vmatpush3.msra.mxu1 %v7928_v2  ;;  %5000 = vmatmul.mubr.f32.gmra.mxu0 %v2805_v11  ;;  %v2834_v11 = vsub.f32 %v7113_v48, %v7731_v39 }
 0x284   :  { %5062 = vmatmul.mubr.f32.gmra.mxu1 %v7106_v42  ;;  %5084 = vmatprep.subr.mxu0 %v7929_v52 }
 0x285   :  { %5148 = vmatprep.subr.mxu1 %v7930_v34  ;;  %5085 = vmatpush3.msra.mxu0 %v7929_v52  ;;  %v2844_v52 = vsub.f32 %v7126_v25, %v2843_v32  ;;  %v2835_v39 = vand.u32 4294901760, %v2834_v11 }
 0x286   :  { %5149 = vmatpush3.msra.mxu1 %v7930_v34  ;;  %5152 = vmatprep.mubr.f32.mxu1 %v2693_v38  ;;  %v7933_v38 = vld [vmem:[#allocation6_spill] sm:$0xff] }
 0x287   :  { %5086 = vmatprep.subr.mxu0 %v7931_v62  ;;  %5150 = vmatprep.subr.mxu1 %v7932_v45  ;;  %v2845_v28 = vand.u32 4294901760, %v2844_v52 }
 0x288   :  { %5002 = vmatprep.mubr.f32.mxu0 %v2815_v5  ;;  %5087 = vmatpush3.msra.mxu0 %v7931_v62  ;;  %v7934_v5 = vld [vmem:[#allocation14_spill] sm:$0xff] }
 0x289   :  { %5151 = vmatpush3.msra.mxu1 %v7932_v45  ;;  %5003 = vmatmul.mubr.f32.gmra.mxu0 %v2825_v59 }
 0x28a   :  { %5088 = vmatprep.subr.mxu0 %v7933_v38  ;;  %5153 = vmatmul.mubr.f32.vlgmr.msra.gmra.mxu1 %v2703_v47  ;;  %v7935_v47 = vld [vmem:[#allocation23_spill] sm:$0xff] }
 0x28b   :  { %5232 = vmatprep.subr.mxu1 %v7899_v27  ;;  %5089 = vmatpush3.msra.mxu0 %v7933_v38 }
 0x28c   :  { %5155 = vmatprep.mubr.f32.mxu1 %v2713_v19  ;;  %5233 = vmatpush3.msra.mxu1 %v7899_v27  ;;  %v7936_v27 = vld [vmem:[#allocation34_spill] sm:$0xff]  ;;  %v7944_v19 = vand.u32 4294901760, %v7056_v14 }
 0x28d   :  { %5090 = vmatprep.subr.mxu0 %v7934_v5  ;;  %5234 = vmatprep.subr.mxu1 %v7901_v56 }
 0x28e   :  { %5005 = vmatprep.mubr.f32.mxu0 %v2835_v39  ;;  %5091 = vmatpush3.msra.mxu0 %v7934_v5 }
 0x28f   :  { %5235 = vmatpush3.msra.mxu1 %v7901_v56  ;;  %5006 = vmatmul.mubr.f32.gmra.mxu0 %v2845_v28  ;;  %v7937_v56 = vld [vmem:[#allocation13_spill] sm:$0xff] }
 0x290   :  { %5092 = vmatprep.subr.mxu0 %v7935_v47  ;;  %5156 = vmatmul.mubr.f32.gmra.mxu1 %v2723_v15  ;;  %v7943_v15 = vld [vmem:[#allocation16_spill] sm:$0xff] }
 0x291   :  { %5236 = vmatprep.subr.mxu1 %v7902_v12  ;;  %5093 = vmatpush3.msra.mxu0 %v7935_v47 }
 0x292   :  { %5096 = vmatprep.mubr.f32.mxu0 %v6918_v43  ;;  %5158 = vmatprep.mubr.f32.mxu1 %v2733_v57  ;;  %v7938_v43 = vld [vmem:[#allocation7_spill] sm:$0xff] }
 0x293   :  { %5237 = vmatpush3.msra.mxu1 %v7902_v12  ;;  %5094 = vmatprep.subr.mxu0 %v7936_v27  ;;  %v7941_v12 = vld [vmem:[#allocation18_spill] sm:$0xff]  ;;  %v7951_v57 = vld [vmem:[#allocation31_spill] sm:$0xff] }
 0x294   :  { %5238 = vmatprep.subr.mxu1 %v7903_v37  ;;  %5095 = vmatpush3.msra.mxu0 %v7936_v27 }
 0x295   :  { %5239 = vmatpush3.msra.mxu1 %v7903_v37  ;;  %5097 = vmatmul.mubr.f32.vlgmr.msra.gmra.mxu0 %v6905_v13  ;;  %v7939_v13 = vld [vmem:[#allocation57_spill] sm:$0xff] }
 0x296   :  { %5159 = vmatmul.mubr.f32.gmra.mxu1 %v2743_v24  ;;  %5176 = vmatprep.subr.mxu0 %v7937_v56  ;;  %v7945_v37 = vld [vmem:[#allocation25_spill] sm:$0xff]  ;;  %v7948_v24 = vand.u32 4294901760, %v7085_v55 }
 0x297   :  { %5240 = vmatprep.subr.mxu1 %v7904_v54  ;;  %5099 = vmatprep.mubr.f32.mxu0 %v6947_v44  ;;  %v7940_v44 = vand.u32 4294901760, %v7026_v16 }
 0x298   :  { %5161 = vmatprep.mubr.f32.mxu1 %v2753_v9  ;;  %5177 = vmatpush3.msra.mxu0 %v7937_v56  ;;  %v7954_v9 = vld [vmem:[#allocation39_spill] sm:$0xff] }
 0x299   :  { %5241 = vmatpush3.msra.mxu1 %v7904_v54  ;;  %5178 = vmatprep.subr.mxu0 %v7938_v43  ;;  %v7949_v54 = vld [vmem:[#allocation33_spill] sm:$0xff] }
 0x29a   :  { %5242 = vmatprep.subr.mxu1 %v7910_v6  ;;  %5179 = vmatpush3.msra.mxu0 %v7938_v43 }
 0x29b   :  { %5243 = vmatpush3.msra.mxu1 %v7910_v6  ;;  %5100 = vmatmul.mubr.f32.gmra.mxu0 %v6931_v7  ;;  %v7942_v7 = vand.u32 4294901760, %v7044_v8  ;;  %v7953_v6 = vld [vmem:[#allocation45_spill] sm:$0xff] }
 0x29c   :  { %5162 = vmatmul.mubr.f32.gmra.mxu1 %v2763_v63  ;;  %5180 = vmatprep.subr.mxu0 %v7939_v13  ;;  %v7955_v63 = vld [vmem:[#allocation47_spill] sm:$0xff] }
 0x29d   :  { %5244 = vmatprep.subr.mxu1 %v7912_v50  ;;  %5102 = vmatprep.mubr.f32.mxu0 %v6973_v22  ;;  %v7947_v22 = vld [vmem:[#allocation21_spill] sm:$0xff] }
 0x29e   :  { %5164 = vmatprep.mubr.f32.mxu1 %v7940_v44  ;;  %5181 = vmatpush3.msra.mxu0 %v7939_v13 }
 0x29f   :  { %5245 = vmatpush3.msra.mxu1 %v7912_v50  ;;  %5182 = vmatprep.subr.mxu0 %v7941_v12  ;;  %v7957_v50 = vld [vmem:[#allocation20_spill] sm:$0xff] }
 0x2a0   :  { %5246 = vmatprep.subr.mxu1 %v7916_v51  ;;  %5183 = vmatpush3.msra.mxu0 %v7941_v12 }
 0x2a1   :  { %5247 = vmatpush3.msra.mxu1 %v7916_v51  ;;  %5103 = vmatmul.mubr.f32.gmra.mxu0 %v6962_v30  ;;  %v7946_v30 = vand.u32 4294901760, %v7072_v33  ;;  %v7959_v51 = vld [vmem:[#allocation35_spill] sm:$0xff] }
 0x2a2   :  { %5165 = vmatmul.mubr.f32.gmra.mxu1 %v7942_v7  ;;  %5184 = vmatprep.subr.mxu0 %v7943_v15 }
 0x2a3   :  { %5248 = vmatprep.subr.mxu1 %v7918_v4  ;;  %5105 = vmatprep.mubr.f32.mxu0 %v6998_v21  ;;  %v7952_v21 = vand.u32 4294901760, %v7113_v48 }
 0x2a4   :  { %5167 = vmatprep.mubr.f32.mxu1 %v7944_v19  ;;  %5185 = vmatpush3.msra.mxu0 %v7943_v15 }
 0x2a5   :  { %5249 = vmatpush3.msra.mxu1 %v7918_v4  ;;  %5186 = vmatprep.subr.mxu0 %v7945_v37 }
 0x2a6   :  { %5250 = vmatprep.subr.mxu1 %v7920_v0  ;;  %5187 = vmatpush3.msra.mxu0 %v7945_v37 }
 0x2a7   :  { %5251 = vmatpush3.msra.mxu1 %v7920_v0  ;;  %5106 = vmatmul.mubr.f32.gmra.mxu0 %v6989_v61  ;;  %v7950_v61 = vand.u32 4294901760, %v7100_v53 }
 0x2a8   :  { %5168 = vmatmul.mubr.f32.gmra.mxu1 %v7946_v30  ;;  %5188 = vmatprep.subr.mxu0 %v7947_v22 }
 0x2a9   :  { %5252 = vmatprep.subr.mxu1 %v7922_v17  ;;  %5108 = vmatprep.mubr.f32.mxu0 %v7026_v16  ;;  %v7956_v16 = vld [vmem:[#allocation11_spill] sm:$0xff] }
 0x2aa   :  { %5170 = vmatprep.mubr.f32.mxu1 %v7948_v24  ;;  %5189 = vmatpush3.msra.mxu0 %v7947_v22 }
 0x2ab   :  { %5253 = vmatpush3.msra.mxu1 %v7922_v17  ;;  %5190 = vmatprep.subr.mxu0 %v7949_v54 }
 0x2ac   :  { %5254 = vmatprep.subr.mxu1 %v7924_v60  ;;  %5191 = vmatpush3.msra.mxu0 %v7949_v54 }
 0x2ad   :  { %5255 = vmatpush3.msra.mxu1 %v7924_v60  ;;  %5109 = vmatmul.mubr.f32.gmra.mxu0 %v7044_v8  ;;  %v7958_v8 = vld [vmem:[#allocation29_spill] sm:$0xff] }
 0x2ae   :  { %5171 = vmatmul.mubr.f32.gmra.mxu1 %v7950_v61  ;;  %5192 = vmatprep.subr.mxu0 %v7951_v57 }
 0x2af   :  { %5256 = vmatprep.subr.mxu1 %v7926_v41  ;;  %5111 = vmatprep.mubr.f32.mxu0 %v7056_v14 }
 0x2b0   :  { %5173 = vmatprep.mubr.f32.mxu1 %v7952_v21  ;;  %5193 = vmatpush3.msra.mxu0 %v7951_v57 }
 0x2b1   :  { %5257 = vmatpush3.msra.mxu1 %v7926_v41  ;;  %5194 = vmatprep.subr.mxu0 %v7953_v6 }
 0x2b2   :  { %5258 = vmatprep.subr.mxu1 %v7928_v2  ;;  %5195 = vmatpush3.msra.mxu0 %v7953_v6 }
 0x2b3   :  { %5259 = vmatpush3.msra.mxu1 %v7928_v2  ;;  %5112 = vmatmul.mubr.f32.gmra.mxu0 %v7072_v33 }
 0x2b4   :  { %5174 = vmatmul.mubr.f32.gmra.mxu1 %v2843_v32  ;;  %5196 = vmatprep.subr.mxu0 %v7954_v9 }
 0x2b5   :  { %5260 = vmatprep.subr.mxu1 %v7930_v34  ;;  %5114 = vmatprep.mubr.f32.mxu0 %v7085_v55 }
 0x2b6   :  { %5197 = vmatpush3.msra.mxu0 %v7954_v9  ;;  %5261 = vmatpush3.msra.mxu1 %v7930_v34  ;;  %v7397_v9 = vld [vmem:[%s7532_s6] ss:$0 sm:$0xff] }
 0x2b7   :  { %5264 = vmatprep.mubr.f32.mxu1 %v6907_v35  ;;  %5198 = vmatprep.subr.mxu0 %v7955_v63 }
 0x2b8   :  { %5262 = vmatprep.subr.mxu1 %v7932_v45  ;;  %5199 = vmatpush3.msra.mxu0 %v7955_v63 }
 0x2b9   :  { %5263 = vmatpush3.msra.mxu1 %v7932_v45  ;;  %5115 = vmatmul.mubr.f32.gmra.mxu0 %v7100_v53 }
 0x2ba   :  { %5200 = vmatprep.subr.mxu0 %v7956_v16  ;;  %5265 = vmatmul.mubr.f32.vlgmr.msra.gmra.mxu1 %v6897_v31 }
 0x2bb   :  { %5117 = vmatprep.mubr.f32.mxu0 %v7113_v48  ;;  %5201 = vmatpush3.msra.mxu0 %v7956_v16 }
 0x2bc   :  { %5267 = vmatprep.mubr.f32.mxu1 %v6933_v20  ;;  %5202 = vmatprep.subr.mxu0 %v7957_v50 }
 0x2bd   :  { %5203 = vmatpush3.msra.mxu0 %v7957_v50 }
 0x2be   :  { %5118 = vmatmul.mubr.f32.gmra.mxu0 %v7126_v25  ;;  %5204 = vmatprep.subr.mxu0 %v7958_v8 }
 0x2bf   :  { %5268 = vmatmul.mubr.f32.gmra.mxu1 %v6920_v40  ;;  %5205 = vmatpush3.msra.mxu0 %v7958_v8 }
 0x2c0   :  { %5208 = vmatprep.mubr.f32.mxu0 %v6907_v35  ;;  %5270 = vmatprep.mubr.f32.mxu1 %v6964_v36 }
 0x2c1   :  { %5206 = vmatprep.subr.mxu0 %v7959_v51 }
 0x2c2   :  { %5207 = vmatpush3.msra.mxu0 %v7959_v51 }
 0x2c3   :  { %5209 = vmatmul.mubr.f32.vlgmr.msra.gmra.mxu0 %v6897_v31  ;;  %5271 = vmatmul.mubr.f32.gmra.mxu1 %v6951_v18 }
 0x2c4   :  { %5211 = vmatprep.mubr.f32.mxu0 %v6933_v20  ;;  %5273 = vmatprep.mubr.f32.mxu1 %v6982_v46 }
 0x2c7   :  { %5212 = vmatmul.mubr.f32.gmra.mxu0 %v6920_v40  ;;  %5274 = vmatmul.mubr.f32.gmra.mxu1 %v6967_v1 }
 0x2c8   :  { %5214 = vmatprep.mubr.f32.mxu0 %v6964_v36  ;;  %5276 = vmatprep.mubr.f32.mxu1 %v7014_v29 }
 0x2cb   :  { %5215 = vmatmul.mubr.f32.gmra.mxu0 %v6951_v18  ;;  %5277 = vmatmul.mubr.f32.gmra.mxu1 %v7012_v49 }
 0x2cc   :  { %5217 = vmatprep.mubr.f32.mxu0 %v6982_v46  ;;  %5279 = vmatprep.mubr.f32.mxu1 %v7037_v58 }
 0x2cf   :  { %5218 = vmatmul.mubr.f32.gmra.mxu0 %v6967_v1  ;;  %5280 = vmatmul.mubr.f32.gmra.mxu1 %v7048_v23 }
 0x2d0   :  { %5220 = vmatprep.mubr.f32.mxu0 %v7014_v29  ;;  %5282 = vmatprep.mubr.f32.mxu1 %v7067_v26 }
 0x2d3   :  { %5221 = vmatmul.mubr.f32.gmra.mxu0 %v7012_v49  ;;  %5283 = vmatmul.mubr.f32.gmra.mxu1 %v7078_v3 }
 0x2d4   :  { %5223 = vmatprep.mubr.f32.mxu0 %v7037_v58  ;;  %5285 = vmatprep.mubr.f32.mxu1 %v7095_v10 }
 0x2d7   :  { %5224 = vmatmul.mubr.f32.gmra.mxu0 %v7048_v23  ;;  %5286 = vmatmul.mubr.f32.gmra.mxu1 %v7106_v42 }
 0x2d8   :  { %5226 = vmatprep.mubr.f32.mxu0 %v7067_v26 }
 0x2db   :  { %5227 = vmatmul.mubr.f32.gmra.mxu0 %v7078_v3 }
 0x2dc   :  { %5229 = vmatprep.mubr.f32.mxu0 %v7095_v10 }
 0x2df   :  { %5230 = vmatmul.mubr.f32.gmra.mxu0 %v7106_v42 }
 0x31d   :  { %v7304_v31 = vpop.f32.mrf.mxu1 }
 0x31f   :  { %v7306_v35 = vpop.f32.mrf.mxu1 }
 0x321   :  { %v7308_v40 = vpop.f32.mrf.mxu1 }
 0x323   :  { %v7310_v20 = vpop.f32.mrf.mxu1 }
 0x326   :  { %v4986_v18 = vpop.f32.mrf.mxu0  ;;  %v7312_v36 = vpop.f32.mrf.mxu1 }
 0x327   :  { %v2708_v50 = vadd.f32 %v4986_v18, %v7397_v9 }
 0x328   :  { %v2697_v1 = vpop.f32.mrf.mxu0  ;;  %v7314_v46 = vpop.f32.mrf.mxu1 }
 0x329   :  { %v2698_v51 = vadd.f32 %v7397_v9, %v2697_v1 }
 0x32b   :  { %v4989_v49 = vpop.f32.mrf.mxu0 }
 0x32c   :  { %v7316_v29 = vpop.f32.mrf.mxu1 }
 0x32d   :  { %v2717_v58 = vpop.f32.mrf.mxu0 }
 0x32e   :  { %v7318_v23 = vpop.f32.mrf.mxu1 }
 0x331   :  { %v4992_v14 = vpop.f32.mrf.mxu0 }
 0x332   :  { %v7320_v4 = vpop.f32.mrf.mxu1 }
 0x333   :  { %v7322_v26 = vpop.f32.mrf.mxu0 }
 0x334   :  { %v7324_v33 = vpop.f32.mrf.mxu1 }
 0x337   :  { %v7326_v0 = vpop.f32.mrf.mxu0 }
 0x338   :  { %v7328_v48 = vpop.f32.mrf.mxu1 }
 0x339   :  { %v7330_v3 = vpop.f32.mrf.mxu0 }
 0x33a   :  { %v7332_v55 = vpop.f32.mrf.mxu1 }
 0x33d   :  { %v7334_v17 = vpop.f32.mrf.mxu0 }
 0x33e   :  { %v7336_v2 = vpop.f32.mrf.mxu1 }
 0x33f   :  { %v7338_v10 = vpop.f32.mrf.mxu0 }
 0x340   :  { %v7340_v53 = vpop.f32.mrf.mxu1 }
 0x341   :  { %7960 = vst [vmem:[#allocation51_spill] sm:$0xff] %v7340_v53  ;;  %v2999_v53 = vadd.f32 %v7306_v35, %v2698_v51  ;;  %v2768_v35 = vadd.f32 %v7326_v0, %v7397_v9  ;;  %v2788_v0 = vadd.f32 %v7334_v17, %v7397_v9 }
 0x343   :  { %v7342_v60 = vpop.f32.mrf.mxu0 }
 0x344   :  { %v7344_v42 = vpop.f32.mrf.mxu1 }
 0x345   :  { %7961 = vst [vmem:[#allocation44_spill] sm:$0xff] %v7344_v42  ;;  %v7346_v41 = vpop.f32.mrf.mxu0  ;;  %v2718_v42 = vadd.f32 %v7397_v9, %v2717_v58 }
 0x346   :  { %v7348_v45 = vpop.f32.mrf.mxu1 }
 0x347   :  { %7962 = vst [vmem:[#allocation53_spill] sm:$0xff] %v7348_v45  ;;  %v3005_v45 = vadd.f32 %v7304_v31, %v2708_v50  ;;  %v3011_v58 = vadd.f32 %v7310_v20, %v2718_v42 }
 0x349   :  { %v7350_v25 = vpop.f32.mrf.mxu0 }
 0x34a   :  { %v5154_v39 = vpop.f32.mrf.mxu1 }
 0x34b   :  { %v7352_v34 = vpop.f32.mrf.mxu0 }
 0x34c   :  { %v3386_v32 = vpop.f32.mrf.mxu1 }
 0x34f   :  { %v7354_v11 = vpop.f32.mrf.mxu0 }
 0x350   :  { %v7356_v62 = vpop.f32.mrf.mxu1 }
 0x351   :  { %v7358_v59 = vpop.f32.mrf.mxu0 }
 0x352   :  { %7963 = vst [vmem:[#allocation52_spill] sm:$0xff] %v7358_v59  ;;  %v7360_v52 = vpop.f32.mrf.mxu1 }
 0x355   :  { %v5098_v38 = vpop.f32.mrf.mxu0 }
 0x356   :  { %v7362_v5 = vpop.f32.mrf.mxu1 }
 0x357   :  { %v3192_v28 = vpop.f32.mrf.mxu0 }
 0x358   :  { %v7364_v47 = vpop.f32.mrf.mxu1  ;;  %v3193_v59 = vadd.f32 %v3192_v28, %v2999_v53  ;;  %v2758_v28 = vadd.f32 %v7397_v9, %v7330_v3 }
 0x35b   :  { %v5101_v27 = vpop.f32.mrf.mxu0 }
 0x35c   :  { %v7366_v56 = vpop.f32.mrf.mxu1 }
 0x35d   :  { %v3206_v43 = vpop.f32.mrf.mxu0 }
 0x35e   :  { %v7368_v13 = vpop.f32.mrf.mxu1 }
 0x361   :  { %v5104_v44 = vpop.f32.mrf.mxu0 }
 0x362   :  { %v7370_v12 = vpop.f32.mrf.mxu1 }
 0x363   :  { %v3220_v7 = vpop.f32.mrf.mxu0 }
 0x364   :  { %v7372_v15 = vpop.f32.mrf.mxu1 }
 0x365   :  { %7964 = vst [vmem:[#allocation55_spill] sm:$0xff] %v7372_v15 }
 0x367   :  { %v7374_v19 = vpop.f32.mrf.mxu0 }
 0x368   :  { %v7376_v37 = vpop.f32.mrf.mxu1 }
 0x369   :  { %7965 = vst [vmem:[#allocation9_spill] sm:$0xff] %v7376_v37  ;;  %v7378_v30 = vpop.f32.mrf.mxu0  ;;  %v3200_v37 = vadd.f32 %v5098_v38, %v3005_v45 }
 0x36a   :  { %v7380_v22 = vpop.f32.mrf.mxu1 }
 0x36b   :  { %7966 = vst [vmem:[#allocation10_spill] sm:$0xff] %v7380_v22  ;;  %v3395_v45 = vadd.f32 %v5154_v39, %v3200_v37 }
 0x36d   :  { %v7382_v24 = vpop.f32.mrf.mxu0 }
 0x36e   :  { %v7384_v54 = vpop.f32.mrf.mxu1 }
 0x36f   :  { %7967 = vst [vmem:[#allocation38_spill] sm:$0xff] %v7384_v54  ;;  %v7386_v61 = vpop.f32.mrf.mxu0 }
 0x370   :  { %v7388_v57 = vpop.f32.mrf.mxu1 }
 0x371   :  { %7968 = vst [vmem:[#allocation5_spill] sm:$0xff] %v7388_v57 }
 0x373   :  { %v7390_v21 = vpop.f32.mrf.mxu0 }
 0x374   :  { %v7392_v6 = vpop.f32.mrf.mxu1 }
 0x375   :  { %7969 = vst [vmem:[#allocation41_spill] sm:$0xff] %v7392_v6  ;;  %v7399_v63 = vpop.f32.mrf.mxu0  ;;  %v2728_v6 = vadd.f32 %v4989_v49, %v7397_v9  ;;  %v2738_v49 = vadd.f32 %v7397_v9, %v7322_v26 }
 0x376   :  { %v7401_v16 = vpop.f32.mrf.mxu1 }
 0x377   :  { %7970 = vst [vmem:[#allocation58_spill] sm:$0xff] %v7401_v16  ;;  %v3017_v1 = vadd.f32 %v7308_v40, %v2728_v6  ;;  %v3387_v40 = vadd.f32 %v3386_v32, %v3193_v59  ;;  %v3023_v26 = vadd.f32 %v7314_v46, %v2738_v49 }
 0x379   :  { %v7404_v8 = vpop.f32.mrf.mxu0  ;;  %v3214_v50 = vadd.f32 %v5101_v27, %v3017_v1  ;;  %v3221_v32 = vadd.f32 %v3220_v7, %v3023_v26 }
 0x37a   :  { %7971 = vst [vmem:[#allocation50_spill] sm:$0xff] %v7404_v8  ;;  %v5266_v57 = vpop.f32.mrf.mxu1  ;;  %v2748_v8 = vadd.f32 %v4992_v14, %v7397_v9 }
 0x37b   :  { %v7407_v54 = vpop.f32.mrf.mxu0  ;;  %v3411_v39 = vadd.f32 %v7356_v62, %v3214_v50  ;;  %v3035_v62 = vadd.f32 %v7318_v23, %v2758_v28 }
 0x37c   :  { %v3802_v22 = vpop.f32.mrf.mxu1  ;;  %v3029_v14 = vadd.f32 %v7312_v36, %v2748_v8 }
 0x37d   :  { %v3235_v23 = vadd.f32 %v7378_v30, %v3035_v62 }
 0x37e   :  { %v7413_v16 = vpop.f32.mrf.mxu0  ;;  %v3228_v1 = vadd.f32 %v5104_v44, %v3029_v14  ;;  %v2778_v44 = vadd.f32 %v7397_v9, %v7338_v10 }
 0x37f   :  { %7972 = vst [vmem:[#allocation15_spill] sm:$0xff] %v7413_v16  ;;  %v5269_v18 = vpop.f32.mrf.mxu1  ;;  %v3207_v16 = vadd.f32 %v3206_v43, %v3011_v58  ;;  %v3041_v43 = vadd.f32 %v7316_v29, %v2768_v35 }
 0x380   :  { %v7417_v15 = vpop.f32.mrf.mxu0  ;;  %v3047_v58 = vadd.f32 %v7324_v33, %v2778_v44 }
 0x381   :  { %v3814_v31 = vpop.f32.mrf.mxu1  ;;  %v3403_v59 = vadd.f32 %v7360_v52, %v3207_v16  ;;  %v3242_v29 = vadd.f32 %v7374_v19, %v3041_v43  ;;  %v2808_v52 = vadd.f32 %v7342_v60, %v7397_v9  ;;  %v3053_v16 = vadd.f32 %v7320_v4, %v2788_v0  ;;  %v7975_v0 = vld [vmem:[#allocation51_spill] sm:$0xff] }
 0x382   :  { %v3249_v33 = vadd.f32 %v7386_v61, %v3047_v58 }
 0x383   :  { %v5210_v38 = vpop.f32.mrf.mxu0  ;;  %v5272_v51 = vpop.f32.mrf.mxu1  ;;  %v3256_v4 = vadd.f32 %v7382_v24, %v3053_v16 }
 0x384   :  { %v3632_v53 = vadd.f32 %v5210_v38, %v3395_v45  ;;  %v3065_v38 = vadd.f32 %v7328_v48, %v2808_v52 }
 0x385   :  { %v3625_v6 = vpop.f32.mrf.mxu0  ;;  %v3826_v27 = vpop.f32.mrf.mxu1  ;;  %v3459_v26 = vadd.f32 %v7370_v12, %v3256_v4 }
 0x386   :  { %v3809_v20 = vadd.f32 %v5266_v57, %v3632_v53  ;;  %v3626_v42 = vadd.f32 %v3625_v6, %v3387_v40  ;;  %v3270_v48 = vadd.f32 %v7390_v21, %v3065_v38  ;;  %v2848_v6 = vadd.f32 %v7354_v11, %v7397_v9  ;;  %v7981_v16 = vld [vmem:[#allocation15_spill] sm:$0xff] }
 0x387   :  { %v5213_v36 = vpop.f32.mrf.mxu0  ;;  %v5275_v37 = vpop.f32.mrf.mxu1 }
 0x388   :  { %3897 = vst [vmem:[%s7533_s7 + $0x8] sm:$0xff] %v3809_v20  ;;  %v3803_v46 = vadd.f32 %v3802_v22, %v3626_v42  ;;  %v3644_v3 = vadd.f32 %v5213_v36, %v3411_v39  ;;  %v3427_v22 = vadd.f32 %v7362_v5, %v3228_v1  ;;  %v2798_v5 = vadd.f32 %v7397_v9, %v7346_v41  ;;  %v7973_v20 = vld [vmem:[#allocation55_spill] sm:$0xff]  ;;  %v7974_v39 = vld [vmem:[#allocation52_spill] sm:$0xff]  ;;  %v7976_v36 = vld [vmem:[#allocation50_spill] sm:$0xff] }
 0x389   :  { %v3637_v57 = vpop.f32.mrf.mxu0  ;;  %v3838_v17 = vpop.f32.mrf.mxu1  ;;  %v3451_v42 = vadd.f32 %v7973_v20, %v3249_v33  ;;  %v2838_v12 = vadd.f32 %v7397_v9, %v7974_v39 }
 0x38a   :  { %3896 = vst [vmem:[%s7533_s7] sm:$0xff] %v3803_v46  ;;  %v3821_v7 = vadd.f32 %v5269_v18, %v3644_v3  ;;  %v3638_v8 = vadd.f32 %v3637_v57, %v3403_v59  ;;  %v3419_v18 = vadd.f32 %v7364_v47, %v3221_v32  ;;  %v2828_v47 = vadd.f32 %v7350_v25, %v7397_v9  ;;  %v7977_v32 = vld [vmem:[#allocation9_spill] sm:$0xff]  ;;  %v7978_v3 = vld [vmem:[#allocation44_spill] sm:$0xff] }
 0x38b   :  { %v5216_v10 = vpop.f32.mrf.mxu0  ;;  %v5278_v49 = vpop.f32.mrf.mxu1  ;;  %v3059_v40 = vadd.f32 %v7332_v55, %v2798_v5  ;;  %v3475_v46 = vadd.f32 %v7977_v32, %v3270_v48  ;;  %v3089_v59 = vadd.f32 %v7978_v3, %v2848_v6 }
 0x38c   :  { %3899 = vst [vmem:[%s7533_s7 + $0x18] sm:$0xff] %v3821_v7  ;;  %v3815_v19 = vadd.f32 %v3814_v31, %v3638_v8  ;;  %v3656_v50 = vadd.f32 %v5216_v10, %v3427_v22  ;;  %v3443_v31 = vadd.f32 %v7366_v56, %v3242_v29  ;;  %v2818_v56 = vadd.f32 %v7397_v9, %v7352_v34  ;;  %v7979_v29 = vld [vmem:[#allocation10_spill] sm:$0xff]  ;;  %v7980_v8 = vld [vmem:[#allocation53_spill] sm:$0xff] }
 0x38d   :  { %v3649_v60 = vpop.f32.mrf.mxu0  ;;  %v3850_v45 = vpop.f32.mrf.mxu1  ;;  %v3263_v55 = vadd.f32 %v7399_v63, %v3059_v40  ;;  %v3083_v22 = vadd.f32 %v7980_v8, %v2838_v12  ;;  %v3298_v10 = vadd.f32 %v7981_v16, %v3089_v59 }
 0x38e   :  { %3898 = vst [vmem:[%s7533_s7 + $0x10] sm:$0xff] %v3815_v19  ;;  %v3833_v30 = vadd.f32 %v5272_v51, %v3656_v50  ;;  %v3650_v35 = vadd.f32 %v3649_v60, %v3419_v18  ;;  %v3435_v51 = vadd.f32 %v7368_v13, %v3235_v23  ;;  %v3077_v13 = vadd.f32 %v7336_v2, %v2828_v47  ;;  %v7984_v47 = vld [vmem:[#allocation41_spill] sm:$0xff] }
 0x38f   :  { %v5219_v41 = vpop.f32.mrf.mxu0  ;;  %v5281_v14 = vpop.f32.mrf.mxu1  ;;  %v3071_v43 = vadd.f32 %v7975_v0, %v2818_v56  ;;  %v3467_v7 = vadd.f32 %v7979_v29, %v3263_v55  ;;  %v3291_v5 = vadd.f32 %v7417_v15, %v3083_v22  ;;  %v3507_v38 = vadd.f32 %v7984_v47, %v3298_v10 }
 0x390   :  { %3901 = vst [vmem:[%s7533_s7 + $0x28] sm:$0xff] %v3833_v30  ;;  %v3827_v24 = vadd.f32 %v3826_v27, %v3650_v35  ;;  %v3668_v53 = vadd.f32 %v5219_v41, %v3443_v31  ;;  %v3284_v2 = vadd.f32 %v7976_v36, %v3077_v13 }
 0x391   :  { %v3661_v25 = vpop.f32.mrf.mxu0  ;;  %v3862_v27 = vpop.f32.mrf.mxu1  ;;  %v3277_v57 = vadd.f32 %v7407_v54, %v3071_v43  ;;  %v7982_v54 = vld [vmem:[#allocation38_spill] sm:$0xff] }
 0x392   :  { %3900 = vst [vmem:[%s7533_s7 + $0x20] sm:$0xff] %v3827_v24  ;;  %v3845_v61 = vadd.f32 %v5275_v37, %v3668_v53  ;;  %v3662_v28 = vadd.f32 %v3661_v25, %v3435_v51  ;;  %v3491_v19 = vadd.f32 %v7982_v54, %v3284_v2  ;;  %v7985_v24 = vld [vmem:[#allocation58_spill] sm:$0xff] }
 0x393   :  { %v5222_v34 = vpop.f32.mrf.mxu0  ;;  %v5284_v44 = vpop.f32.mrf.mxu1  ;;  %v3499_v53 = vadd.f32 %v7985_v24, %v3291_v5 }
 0x394   :  { %3903 = vst [vmem:[%s7533_s7 + $0x38] sm:$0xff] %v3845_v61  ;;  %v3839_v21 = vadd.f32 %v3838_v17, %v3662_v28  ;;  %v3680_v1 = vadd.f32 %v5222_v34, %v3459_v26 }
 0x395   :  { %v3673_v11 = vpop.f32.mrf.mxu0  ;;  %v3874_v50 = vpop.f32.mrf.mxu1 }
 0x396   :  { %3902 = vst [vmem:[%s7533_s7 + $0x30] sm:$0xff] %v3839_v21  ;;  %v3857_v63 = vadd.f32 %v5278_v49, %v3680_v1  ;;  %v3674_v37 = vadd.f32 %v3673_v11, %v3451_v42 }
 0x397   :  { %v5225_v62 = vpop.f32.mrf.mxu0  ;;  %v5287_v41 = vpop.f32.mrf.mxu1 }
 0x398   :  { %3905 = vst [vmem:[%s7533_s7 + $0x48] sm:$0xff] %v3857_v63  ;;  %v3851_v9 = vadd.f32 %v3850_v45, %v3674_v37  ;;  %v3692_v17 = vadd.f32 %v5225_v62, %v3475_v46  ;;  %v7983_v45 = vld [vmem:[#allocation5_spill] sm:$0xff] }
 0x399   :  { %v3685_v52 = vpop.f32.mrf.mxu0  ;;  %v3483_v4 = vadd.f32 %v7983_v45, %v3277_v57  ;;  %v3886_v25 = vpop.f32.mrf.mxu1 }
 0x39a   :  { %3904 = vst [vmem:[%s7533_s7 + $0x40] sm:$0xff] %v3851_v9  ;;  %v3869_v49 = vadd.f32 %v5281_v14, %v3692_v17  ;;  %v3686_v23 = vadd.f32 %v3685_v52, %v3467_v7 }
 0x39b   :  { %v5228_v18 = vpop.f32.mrf.mxu0 }
 0x39c   :  { %3907 = vst [vmem:[%s7533_s7 + $0x58] sm:$0xff] %v3869_v49  ;;  %v3863_v58 = vadd.f32 %v3862_v27, %v3686_v23  ;;  %v3704_v60 = vadd.f32 %v5228_v18, %v3491_v19 }
 0x39d   :  { %v3697_v30 = vpop.f32.mrf.mxu0 }
 0x39e   :  { %3906 = vst [vmem:[%s7533_s7 + $0x50] sm:$0xff] %v3863_v58  ;;  %v3881_v35 = vadd.f32 %v5284_v44, %v3704_v60  ;;  %v3698_v31 = vadd.f32 %v3697_v30, %v3483_v4 }
 0x39f   :  { %v5231_v14 = vpop.f32.mrf.mxu0 }
 0x3a0   :  { %3909 = vst [vmem:[%s7533_s7 + $0x68] sm:$0xff] %v3881_v35  ;;  %v3875_v15 = vadd.f32 %v3874_v50, %v3698_v31  ;;  %v3716_v33 = vadd.f32 %v5231_v14, %v3507_v38 }
 0x3a1   :  { %v3709_v51 = vpop.f32.mrf.mxu0 }
 0x3a2   :  { %3908 = vst [vmem:[%s7533_s7 + $0x60] sm:$0xff] %v3875_v15  ;;  %v3893_v56 = vadd.f32 %v5287_v41, %v3716_v33  ;;  %v3710_v40 = vadd.f32 %v3709_v51, %v3499_v53 }
 0x3a4   :  { %3911 = vst [vmem:[%s7533_s7 + $0x78] sm:$0xff] %v3893_v56  ;;  %v3887_v48 = vadd.f32 %v3886_v25, %v3710_v40 }
 0x3a6   :  { %3910 = vst [vmem:[%s7533_s7 + $0x70] sm:$0xff] %v3887_v48 }
 0x3a7   :  { %3916 = vsyncpa [#allocation3], 1 }

</bundles_post_ra>
